<compile_context>
chip_gen: v6e
topology: v6e:2x2x1
jax: 0.10.0
libtpu: 0.0.40
codegen_flags: <defaults>
</compile_context>

<pallas_src>
import numpy as np

import jax
import jax.numpy as jnp
from jax.experimental import pallas as pl
from jax.experimental.pallas import tpu as pltpu


# ---------------------------------------------------------------------------
# helpers
# ---------------------------------------------------------------------------

def _round_up(x: int, m: int) -> int:
    return (x + m - 1) // m * m


def _choose_row_tile(rows, in_bytes_per_row, out_bytes_per_row, resident_bytes,
                     target, vmem_budget=12 * 1024 * 1024):
    """Row-tile size: full rows if small, else a multiple of 64 whose
    double-buffered in/out blocks + block-invariant resident bytes fit the VMEM
    budget (budget sized so the same tile also fits v7x's 64 MiB VMEM), capped
    so there are always >= 2 grid steps along the row axis (v7x megacore)."""
    if rows <= 128:
        return rows                                   # full-dim block: always legal
    target = max(64, int(target))
    tm = (target // 64) * 64

    def vmem_bytes(t):
        return (2 * t * in_bytes_per_row              # double-buffered input tile(s)
                + 2 * t * out_bytes_per_row           # double-buffered output tile
                + resident_bytes)                     # weight/bias/x-slab (counted once/2x)

    while tm > 64 and vmem_bytes(tm) > vmem_budget:
        tm = max(64, (tm // 2) // 64 * 64)
    # >= 2 grid steps so both v7x TensorCores get work (harmless loop split on v5e/v6e)
    tm = min(tm, _round_up(-(-rows // 2), 64))
    return max(64, tm)


def _elu(y):
    # ELU(alpha=1): y if y > 0 else exp(y) - 1.  min() clamp bounds garbage rows of
    # the partial last row tile so no inf reaches the masked store path.
    return jnp.where(y > 0, y, jnp.exp(jnp.minimum(y, 0.0)) - 1.0)


# ---------------------------------------------------------------------------
# Pallas kernels
# ---------------------------------------------------------------------------

def _make_linear_kernel(apply_elu: bool):
    """Fused Linear (+bias, +optional ELU) on pre-gathered rows."""
    def kernel(xg_ref, w_ref, b_ref, o_ref):
        # xg_ref: (TM, F)   gathered spiral features (row tile of bs*n_nodes)
        # w_ref : (F, O)    pre-transposed weight -> plain (M,K)x(K,N) MXU dot
        # b_ref : (1, O)    f32 bias
        # o_ref : (TM, O)   output tile (natural width, masked store if O < 128)
        y = jnp.dot(xg_ref[...], w_ref[...], preferred_element_type=jnp.float32)
        y = y + b_ref[...]                       # f32 epilogue (v5e-safe)
        if apply_elu:
            y = _elu(y)
        o_ref[...] = y.astype(o_ref.dtype)
    return kernel


def _make_fused_spiral_kernel(apply_elu: bool, seq_len: int):
    """Fused spiral gather + Linear (+bias, +optional ELU).

    The per-batch activation slab stays VMEM-resident; the spiral row gather is done
    in-kernel with an S-step accumulation, so xg never touches HBM."""
    def kernel(idx_ref, x_ref, w_ref, b_ref, o_ref):
        # idx_ref: (TM, S)        spiral indices for this row tile (int32)
        # x_ref  : (1, N_in, C)   VMEM-resident activation slab for batch element b
        # w_ref  : (S, C, O)      weight, reshaped/transposed once in the wrapper
        # b_ref  : (1, O)         f32 bias
        # o_ref  : (1, TM, O)     output tile
        x2d = x_ref[0]                          # (N_in, C)
        idx = idx_ref[...]                      # (TM, S)
        tm = idx.shape[0]
        in_ch = x2d.shape[1]
        acc = jnp.zeros((tm, o_ref.shape[-1]), jnp.float32)
        for s in range(seq_len):                # static unroll over spiral positions
            gidx = jnp.broadcast_to(idx[:, s:s + 1], (tm, in_ch))
            rows = jnp.take_along_axis(x2d, gidx, axis=0, mode="clip")   # (TM, C) row gather
            acc = acc + jnp.dot(rows, w_ref[s], preferred_element_type=jnp.float32)
        acc = acc + b_ref[...]
        if apply_elu:
            acc = _elu(acc)
        o_ref[0] = acc.astype(o_ref.dtype)
    return kernel


# ---------------------------------------------------------------------------
# SpiralConv implementations
# ---------------------------------------------------------------------------

def _spiral_conv_fused(x, indices, weight, bias, *, out_dtype, tm, apply_elu,
                       vmem_limit_bytes):
    """Fused-gather SpiralConv.  x: (bs, N_in, C); indices: (n_nodes, S) int32;
    weight: (O, S*C); bias: (O,) f32."""
    bs, n_in, in_ch = x.shape
    n_nodes, seq_len = indices.shape
    o_out = weight.shape[0]
    # W[o, s*C + c] -> w3[s, c, o]  (one-time wrapper-side transpose)
    w3 = weight.reshape(o_out, seq_len, in_ch).transpose(1, 2, 0)
    bias2d = bias.reshape(1, o_out)

    n_tiles = pl.cdiv(n_nodes, tm)
    pad_rows = n_tiles * tm - n_nodes
    if pad_rows:
        # pad with index 0 (valid); the corresponding output rows are masked on store
        indices = jnp.pad(indices, ((0, pad_rows), (0, 0)))

    out = pl.pallas_call(
        _make_fused_spiral_kernel(apply_elu, seq_len),
        out_shape=jax.ShapeDtypeStruct((bs, n_nodes, o_out), out_dtype),
        grid_spec=pltpu.PrefetchScalarGridSpec(
            num_scalar_prefetch=0,
            grid=(bs, n_tiles),
            in_specs=[
                pl.BlockSpec((tm, seq_len), lambda b, i: (i, 0)),        # spiral indices
                pl.BlockSpec((1, n_in, in_ch), lambda b, i: (b, 0, 0)),  # x slab (resident per b)
                pl.BlockSpec((seq_len, in_ch, o_out), lambda b, i: (0, 0, 0)),  # weight
                pl.BlockSpec((1, o_out), lambda b, i: (0, 0)),           # bias
            ],
            out_specs=pl.BlockSpec((1, tm, o_out), lambda b, i: (b, i, 0)),
        ),
        compiler_params=pltpu.CompilerParams(
            dimension_semantics=("parallel", "parallel"),
            vmem_limit_bytes=vmem_limit_bytes),
    )(indices, x, w3, bias2d)
    return out


def _spiral_conv_gathered(x, indices, weight, bias, *, out_dtype, row_tile,
                          apply_elu, vmem_limit_bytes):
    """Fallback SpiralConv: XLA gather + Pallas fused Linear/bias/ELU."""
    bs, _, in_ch = x.shape
    n_nodes, seq_len = indices.shape
    o_out, feat = weight.shape
    in_isz = jnp.dtype(x.dtype).itemsize
    out_isz = jnp.dtype(out_dtype).itemsize

    # TODO(synk): remove this XLA gather once Mosaic guarantees the sublane row
    # gather at all table sizes (the fused path already does it where supported).
    xg = jnp.take(x, indices.reshape(-1), axis=1)        # (bs, n_nodes*S, C)
    xg = xg.reshape(bs * n_nodes, feat)                  # fold batch into MXU rows
    # feat kept at natural width: padding xg here would add a full HBM copy of the
    # dominant intermediate, which costs more than lane-dense K feeding saves.

    w2 = weight.T                                        # (feat, O): plain (M,K)x(K,N) dot
    bias2d = bias.reshape(1, o_out)

    rows = bs * n_nodes
    resident = feat * o_out * in_isz + o_out * 4         # weight counted once (invariant)
    tm = _choose_row_tile(rows, feat * in_isz, o_out * out_isz, resident, row_tile)
    grid = (pl.cdiv(rows, tm),)

    out = pl.pallas_call(
        _make_linear_kernel(apply_elu),
        out_shape=jax.ShapeDtypeStruct((rows, o_out), out_dtype),
        grid_spec=pltpu.PrefetchScalarGridSpec(
            num_scalar_prefetch=0,
            grid=grid,
            in_specs=[
                pl.BlockSpec((tm, feat), lambda i: (i, 0)),      # row tile
                pl.BlockSpec((feat, o_out), lambda i: (0, 0)),   # resident weight
                pl.BlockSpec((1, o_out), lambda i: (0, 0)),      # resident bias
            ],
            out_specs=pl.BlockSpec((tm, o_out), lambda i: (i, 0)),
        ),
        compiler_params=pltpu.CompilerParams(
            dimension_semantics=("parallel",),
            vmem_limit_bytes=vmem_limit_bytes),
    )(xg, w2, bias2d)
    return out.reshape(bs, n_nodes, o_out)


# --- auto-probe: is the fused (in-kernel gather) path usable on this backend? ---

_FUSE_GATHER_PROBE = {}


def _fused_gather_supported(n_in, in_ch, seq_len, o_out, tm, in_dtype, out_dtype,
                            apply_elu, vmem_limit_bytes):
    """Compile + numerically verify the fused-gather kernel at this shape signature.
    Falls back (returns False) whenever Mosaic cannot lower the in-kernel row gather
    or it miscomputes, so the caller can use the XLA-gather path instead."""
    key = (n_in, in_ch, seq_len, o_out, tm, str(jnp.dtype(in_dtype)),
           str(jnp.dtype(out_dtype)), bool(apply_elu))
    cached = _FUSE_GATHER_PROBE.get(key)
    if cached is not None:
        return cached
    ok = False
    try:
        rng = np.random.RandomState(0)
        x_np = rng.uniform(-1.0, 1.0, (1, n_in, in_ch)).astype(np.float32)
        w_np = rng.uniform(-0.1, 0.1, (o_out, seq_len * in_ch)).astype(np.float32)
        b_np = rng.uniform(-0.5, 0.5, (o_out,)).astype(np.float32)
        idx_np = rng.randint(0, n_in, (tm, seq_len)).astype(np.int32)

        x_p = jnp.asarray(x_np, in_dtype)
        w_p = jnp.asarray(w_np, in_dtype)
        got = _spiral_conv_fused(x_p, jnp.asarray(idx_np), w_p, jnp.asarray(b_np),
                                 out_dtype=out_dtype, tm=tm, apply_elu=apply_elu,
                                 vmem_limit_bytes=vmem_limit_bytes)
        got = np.asarray(jax.block_until_ready(got)).astype(np.float32)[0]

        # reference, computed from the values the kernel actually saw (post-cast)
        x_used = np.asarray(x_p).astype(np.float32)[0]
        w_used = np.asarray(w_p).astype(np.float32)
        xg = x_used[idx_np.reshape(-1)].reshape(tm, seq_len * in_ch)
        ref = xg @ w_used.T + b_np
        if apply_elu:
            ref = np.where(ref > 0, ref, np.expm1(np.minimum(ref, 0.0)))
        ok = bool(np.allclose(got, ref, rtol=5e-2, atol=5e-2))
    except Exception:
        ok = False
    _FUSE_GATHER_PROBE[key] = ok
    return ok


# ---------------------------------------------------------------------------
# Public SpiralConv wrapper
# ---------------------------------------------------------------------------

def spiral_conv(x, indices, weight, bias, *, apply_elu=False, compute_dtype=None,
                out_dtype=None, row_tile=1024, vmem_limit_bytes=32 * 1024 * 1024,
                fuse_gather="auto", fuse_gather_max_bytes=8 * 1024 * 1024):
    """SpiralConv forward: spiral gather, then Linear (+ optional fused ELU).

    x:       (bs, n_nodes_in, C) or (n_nodes_in, C)
    indices: (n_nodes, S) int32 spiral indices into the node axis of x
    weight:  (O, C*S)  -- PyTorch nn.Linear layout
    bias:    (O,)
    fuse_gather: "auto" (probe, recommended) | True (force) | False (XLA gather)
    """
    squeeze_batch = x.ndim == 2
    if squeeze_batch:
        x = x[None]
    elif x.ndim != 3:
        raise RuntimeError(
            f"x.dim() is expected to be 2 or 3, but received {x.ndim}")

    bs, n_in, in_ch = x.shape
    n_nodes, seq_len = indices.shape
    out_ch = weight.shape[0]
    feat = in_ch * seq_len
    assert weight.shape == (out_ch, feat)
    indices = indices.astype(jnp.int32)

    if out_dtype is None:
        out_dtype = x.dtype
    if compute_dtype is not None:
        # NOTE: the weight is cast too (fast path); keep it f32 here if bit-closer
        # parity with the PyTorch f32 Linear is required.
        x = x.astype(compute_dtype)
        weight = weight.astype(compute_dtype)
    in_dtype = x.dtype
    in_isz = jnp.dtype(in_dtype).itemsize
    out_isz = jnp.dtype(out_dtype).itemsize

    # Output width: natural when O <= 128 (typical emb_dim) -> no padded stores and
    # no per-layer slice copy; pad to a 128 multiple only for large ragged O.
    if out_ch > 128 and out_ch % 128:
        o_out = _round_up(out_ch, 128)
        weight = jnp.pad(weight, ((0, o_out - out_ch), (0, 0)))
        bias = jnp.pad(bias, (0, o_out - out_ch))
    else:
        o_out = out_ch
    bias = bias.astype(jnp.float32)

    use_fused = False
    tm_f = None
    if fuse_gather and n_in * in_ch * in_isz <= fuse_gather_max_bytes:
        resident = (2 * n_in * in_ch * in_isz            # x slab (double-buffered over batch)
                    + feat * o_out * in_isz              # weight, counted once (invariant)
                    + o_out * 4)                         # bias
        tm_f = _choose_row_tile(n_nodes, seq_len * 4, o_out * out_isz,
                                resident, row_tile)
        if fuse_gather == "auto":
            use_fused = _fused_gather_supported(n_in, in_ch, seq_len, o_out, tm_f,
                                                in_dtype, out_dtype, apply_elu,
                                                vmem_limit_bytes)
        else:
            use_fused = True

    if use_fused:
        out = _spiral_conv_fused(x, indices, weight, bias, out_dtype=out_dtype,
                                 tm=tm_f, apply_elu=apply_elu,
                                 vmem_limit_bytes=vmem_limit_bytes)
    else:
        out = _spiral_conv_gathered(x, indices, weight, bias, out_dtype=out_dtype,
                                    row_tile=row_tile, apply_elu=apply_elu,
                                    vmem_limit_bytes=vmem_limit_bytes)

    if o_out != out_ch:
        out = out[..., :out_ch]
    if squeeze_batch:
        out = out[0]
    return out


# ---------------------------------------------------------------------------
# Pool (sparse up-sampling) and the SpiralDecoder forward
# ---------------------------------------------------------------------------

def pool(x, up_transform):
    """Pool(x, trans, dim=1): out[:, r, :] += x[:, c, :] * v for sparse trans."""
    row, col, val, n_out = up_transform
    # TODO(synk): compose the sparse up-transform with the next level's spiral
    # indices (host-side CSR) so the pooled activation never round-trips HBM;
    # the XLA scatter-add stays for now.
    gathered = jnp.take(x, col, axis=1) * val.astype(x.dtype)[None, :, None]
    out = jnp.zeros((x.shape[0], n_out, x.shape[-1]), x.dtype)
    return out.at[:, row, :].add(gathered)


def spiral_decoder_forward(x, spiral_indices, up_transforms, params, *,
                           compute_dtype=None, row_tile=1024, fuse_gather="auto",
                           vmem_limit_bytes=32 * 1024 * 1024):
    """SpiralDecoder.forward: [Pool -> SpiralConv -> ELU] per level + final SpiralConv.

    With compute_dtype=bf16 the intermediate activations (and the Pool intermediates)
    are carried in bf16 end-to-end; only the final layer emits the input dtype."""
    num_layer = len(up_transforms)
    final_dtype = x.dtype
    act_dtype = jnp.dtype(compute_dtype) if compute_dtype is not None else x.dtype
    if compute_dtype is not None:
        x = x.astype(compute_dtype)
    for i in range(num_layer):
        lvl = num_layer - 1 - i                        # coarse -> fine
        x = pool(x, up_transforms[lvl])
        w, b = params[i]
        x = spiral_conv(x, spiral_indices[lvl], w, b, apply_elu=True,
                        compute_dtype=compute_dtype, out_dtype=act_dtype,
                        row_tile=row_tile, fuse_gather=fuse_gather,
                        vmem_limit_bytes=vmem_limit_bytes)
    w, b = params[num_layer]
    return spiral_conv(x, spiral_indices[0], w, b, apply_elu=False,
                       compute_dtype=compute_dtype, out_dtype=final_dtype,
                       row_tile=row_tile, fuse_gather=fuse_gather,
                       vmem_limit_bytes=vmem_limit_bytes)


# ---------------------------------------------------------------------------
# Pure-JAX reference (mirrors the PyTorch forward) and init helpers
# ---------------------------------------------------------------------------

def _spiral_conv_ref(x, indices, weight, bias):
    bs, _, c = x.shape
    n, s = indices.shape
    xg = jnp.take(x, indices.reshape(-1), axis=1).reshape(bs, n, s * c)
    return xg @ weight.T + bias


def _decoder_ref(x, spiral_indices, up_transforms, params):
    num_layer = len(up_transforms)
    for i in range(num_layer):
        lvl = num_layer - 1 - i
        x = pool(x, up_transforms[lvl])
        w, b = params[i]
        x = jax.nn.elu(_spiral_conv_ref(x, spiral_indices[lvl], w, b))
    w, b = params[num_layer]
    return _spiral_conv_ref(x, spiral_indices[0], w, b)


def _xavier_uniform(key, out_features, in_features, dtype=jnp.float32):
    bound = float(np.sqrt(6.0 / (in_features + out_features)))
    return jax.random.uniform(key, (out_features, in_features), dtype,
                              minval=-bound, maxval=bound)


def _make_up_transform(key, n_out, n_in, nnz):
    kr, kc, kv = jax.random.split(key, 3)
    row = jax.random.randint(kr, (nnz,), 0, n_out, dtype=jnp.int32)
    col = jax.random.randint(kc, (nnz,), 0, n_in, dtype=jnp.int32)
    val = jax.random.uniform(kv, (nnz,), jnp.float32, minval=0.1, maxval=1.0)
    return row, col, val, n_out


# ---------------------------------------------------------------------------
# Demo / correctness check
# ---------------------------------------------------------------------------

if __name__ == "__main__":
    key = jax.random.PRNGKey(0)
    ks = jax.random.split(key, 16)

    # Small SpiralDecoder: 2 up-sampling levels, uniform emb_dim.
    bs, emb_dim, seq_length = 2, 32, 8
    n_nodes = (64, 32, 16)          # level 0 (finest) ... level 2 (coarsest)
    num_layer = 2

    spiral_indices = [
        jax.random.randint(ks[i], (n_nodes[i], seq_length), 0, n_nodes[i],
                           dtype=jnp.int32)
        for i in range(num_layer + 1)]
    up_transforms = [
        _make_up_transform(ks[3 + j], n_nodes[j], n_nodes[j + 1],
                           nnz=2 * n_nodes[j])
        for j in range(num_layer)]

    params = []
    for i in range(num_layer + 1):
        w = _xavier_uniform(ks[6 + i], emb_dim, emb_dim * seq_length)
        b = jnp.zeros((emb_dim,), jnp.float32)
        params.append((w, b))

    x = jax.random.normal(ks[10], (bs, n_nodes[-1], emb_dim), jnp.float32)

    # 1) full decoder forward, f32 (fused gather if supported, else fallback)
    fwd = jax.jit(lambda xx: spiral_decoder_forward(
        xx, spiral_indices, up_transforms, params))
    y = jax.block_until_ready(fwd(x))
    assert y.shape == (bs, n_nodes[0], emb_dim) and y.dtype == jnp.float32
    y_ref = jax.block_until_ready(
        _decoder_ref(x, spiral_indices, up_transforms, params))
    np.testing.assert_allclose(np.asarray(y), np.asarray(y_ref),
                               rtol=2e-3, atol=2e-3)

    # 2) full decoder forward, bf16 activations end-to-end (final output f32)
    fwd_bf16 = jax.jit(lambda xx: spiral_decoder_forward(
        xx, spiral_indices, up_transforms, params, compute_dtype=jnp.bfloat16))
    y_bf16 = jax.block_until_ready(fwd_bf16(x))
    assert y_bf16.dtype == jnp.float32
    np.testing.assert_allclose(np.asarray(y_bf16), np.asarray(y_ref),
                               rtol=1e-1, atol=2e-1)

    # 3) single SpiralConv, forced XLA-gather fallback path, bf16 inputs,
    #    multi-block row grid (exercises the fallback kernel regardless of probe).
    n_t = 96
    idx_t = jax.random.randint(ks[11], (n_t, seq_length), 0, n_t, dtype=jnp.int32)
    x_t = jax.random.normal(ks[12], (bs, n_t, emb_dim), jnp.float32)
    w_t = _xavier_uniform(ks[13], emb_dim, emb_dim * seq_length)
    b_t = jnp.zeros((emb_dim,), jnp.float32)
    y_t = jax.block_until_ready(
        spiral_conv(x_t, idx_t, w_t, b_t, apply_elu=True,
                    compute_dtype=jnp.bfloat16, out_dtype=jnp.float32,
                    row_tile=64, fuse_gather=False))
    y_t_ref = jax.nn.elu(_spiral_conv_ref(x_t, idx_t, w_t, b_t))
    np.testing.assert_allclose(np.asarray(y_t), np.asarray(y_t_ref),
                               rtol=5e-2, atol=5e-2)

    # 4) 2-D (single-sample) input path, as supported by the PyTorch module.
    y2 = jax.block_until_ready(
        spiral_conv(x[0], spiral_indices[-1], params[-1][0], params[-1][1]))
    y2_ref = _spiral_conv_ref(x[:1], spiral_indices[-1],
                              params[-1][0], params[-1][1])[0]
    np.testing.assert_allclose(np.asarray(y2), np.asarray(y2_ref),
                               rtol=2e-3, atol=2e-3)

    print("KERNEL_OK")
</pallas_src>

<mosaic_0001>
module attributes {stable_mosaic.version = 11 : i64} {
  func.func @kernel(%arg0: i32, %arg1: memref<64x256xf32, #tpu.memory_space<vmem>>, %arg2: memref<256x32xf32, #tpu.memory_space<vmem>>, %arg3: memref<1x32xf32, #tpu.memory_space<vmem>>, %arg4: memref<64x32xf32, #tpu.memory_space<vmem>>) attributes {dimension_semantics = [#tpu.dimension_semantics<parallel>], iteration_bounds = array<i64: 1>, scalar_prefetch = 0 : i64, scratch_operands = 0 : i64, tpu.core_type = #tpu.core_type<tc>, window_params = [{transform_indices = @transform_0, window_bounds = array<i64: 64, 256>}, {pipeline_mode = #tpu.pipeline_mode<synchronous>, transform_indices = @transform_1, window_bounds = array<i64: 256, 32>}, {pipeline_mode = #tpu.pipeline_mode<synchronous>, transform_indices = @transform_2, window_bounds = array<i64: 1, 32>}, {transform_indices = @transform_3, window_bounds = array<i64: 64, 32>}]} {
    %c0 = arith.constant 0 : index
    %c0_0 = arith.constant 0 : index
    %0 = vector.load %arg1[%c0, %c0_0] : memref<64x256xf32, #tpu.memory_space<vmem>>, vector<64x256xf32>
    %c0_1 = arith.constant 0 : index
    %c0_2 = arith.constant 0 : index
    %1 = vector.load %arg2[%c0_1, %c0_2] : memref<256x32xf32, #tpu.memory_space<vmem>>, vector<256x32xf32>
    %cst = arith.constant dense<0.000000e+00> : vector<64x32xf32>
    %2 = tpu.matmul %0, %1, %cst {dimension_numbers = #tpu.dot_dimension_numbers<[1], [0], [0], [1], [0, 0, 1, 1], [], []>} : vector<64x256xf32>, vector<256x32xf32>, vector<64x32xf32> -> vector<64x32xf32>
    %c0_3 = arith.constant 0 : index
    %c0_4 = arith.constant 0 : index
    %3 = vector.load %arg3[%c0_3, %c0_4] : memref<1x32xf32, #tpu.memory_space<vmem>>, vector<1x32xf32>
    %4 = vector.broadcast %3 : vector<1x32xf32> to vector<64x32xf32>
    %5 = arith.addf %2, %4 : vector<64x32xf32>
    %cst_5 = arith.constant 0.000000e+00 : f32
    %6 = vector.broadcast %cst_5 : f32 to vector<64x32xf32>
    %7 = arith.cmpf ogt, %5, %6 : vector<64x32xf32>
    %cst_6 = arith.constant 0.000000e+00 : f32
    %8 = vector.broadcast %cst_6 : f32 to vector<64x32xf32>
    %9 = arith.minimumf %5, %8 : vector<64x32xf32>
    %10 = math.exp %9 : vector<64x32xf32>
    %cst_7 = arith.constant 1.000000e+00 : f32
    %11 = vector.broadcast %cst_7 : f32 to vector<64x32xf32>
    %12 = arith.subf %10, %11 : vector<64x32xf32>
    %13 = arith.select %7, %5, %12 : vector<64x32xi1>, vector<64x32xf32>
    %c0_8 = arith.constant 0 : index
    %c0_9 = arith.constant 0 : index
    %14 = vector.load %arg4[%c0_8, %c0_9] : memref<64x32xf32, #tpu.memory_space<vmem>>, vector<64x32xf32>
    tpu.vector_store %arg4[%c0_8, %c0_9], %13 {strides = array<i32>} : memref<64x32xf32, #tpu.memory_space<vmem>>, vector<64x32xf32>,
    return
  }
  func.func @transform_0(%arg0: i32) -> (i32, i32) {
    %c0_i32 = arith.constant 0 : i32
    %c0_i32_0 = arith.constant 0 : i32
    return %arg0, %c0_i32 : i32, i32
  }
  func.func @transform_1(%arg0: i32) -> (i32, i32) {
    %c0_i32 = arith.constant 0 : i32
    %c0_i32_0 = arith.constant 0 : i32
    %c0_i32_1 = arith.constant 0 : i32
    return %c0_i32, %c0_i32_0 : i32, i32
  }
  func.func @transform_2(%arg0: i32) -> (i32, i32) {
    %c0_i32 = arith.constant 0 : i32
    %c0_i32_0 = arith.constant 0 : i32
    %c0_i32_1 = arith.constant 0 : i32
    return %c0_i32, %c0_i32_0 : i32, i32
  }
  func.func @transform_3(%arg0: i32) -> (i32, i32) {
    %c0_i32 = arith.constant 0 : i32
    %c0_i32_0 = arith.constant 0 : i32
    return %arg0, %c0_i32 : i32, i32
  }
}

module attributes {stable_mosaic.version = 11 : i64} {
  func.func @kernel(%arg0: i32, %arg1: memref<128x256xf32, #tpu.memory_space<vmem>>, %arg2: memref<256x32xf32, #tpu.memory_space<vmem>>, %arg3: memref<1x32xf32, #tpu.memory_space<vmem>>, %arg4: memref<128x32xf32, #tpu.memory_space<vmem>>) attributes {dimension_semantics = [#tpu.dimension_semantics<parallel>], iteration_bounds = array<i64: 1>, scalar_prefetch = 0 : i64, scratch_operands = 0 : i64, tpu.core_type = #tpu.core_type<tc>, window_params = [{transform_indices = @transform_0, window_bounds = array<i64: 128, 256>}, {pipeline_mode = #tpu.pipeline_mode<synchronous>, transform_indices = @transform_1, window_bounds = array<i64: 256, 32>}, {pipeline_mode = #tpu.pipeline_mode<synchronous>, transform_indices = @transform_2, window_bounds = array<i64: 1, 32>}, {transform_indices = @transform_3, window_bounds = array<i64: 128, 32>}]} {
    %c0 = arith.constant 0 : index
    %c0_0 = arith.constant 0 : index
    %0 = vector.load %arg1[%c0, %c0_0] : memref<128x256xf32, #tpu.memory_space<vmem>>, vector<128x256xf32>
    %c0_1 = arith.constant 0 : index
    %c0_2 = arith.constant 0 : index
    %1 = vector.load %arg2[%c0_1, %c0_2] : memref<256x32xf32, #tpu.memory_space<vmem>>, vector<256x32xf32>
    %cst = arith.constant dense<0.000000e+00> : vector<128x32xf32>
    %2 = tpu.matmul %0, %1, %cst {dimension_numbers = #tpu.dot_dimension_numbers<[1], [0], [0], [1], [0, 0, 1, 1], [], []>} : vector<128x256xf32>, vector<256x32xf32>, vector<128x32xf32> -> vector<128x32xf32>
    %c0_3 = arith.constant 0 : index
    %c0_4 = arith.constant 0 : index
    %3 = vector.load %arg3[%c0_3, %c0_4] : memref<1x32xf32, #tpu.memory_space<vmem>>, vector<1x32xf32>
    %4 = vector.broadcast %3 : vector<1x32xf32> to vector<128x32xf32>
    %5 = arith.addf %2, %4 : vector<128x32xf32>
    %cst_5 = arith.constant 0.000000e+00 : f32
    %6 = vector.broadcast %cst_5 : f32 to vector<128x32xf32>
    %7 = arith.cmpf ogt, %5, %6 : vector<128x32xf32>
    %cst_6 = arith.constant 0.000000e+00 : f32
    %8 = vector.broadcast %cst_6 : f32 to vector<128x32xf32>
    %9 = arith.minimumf %5, %8 : vector<128x32xf32>
    %10 = math.exp %9 : vector<128x32xf32>
    %cst_7 = arith.constant 1.000000e+00 : f32
    %11 = vector.broadcast %cst_7 : f32 to vector<128x32xf32>
    %12 = arith.subf %10, %11 : vector<128x32xf32>
    %13 = arith.select %7, %5, %12 : vector<128x32xi1>, vector<128x32xf32>
    %c0_8 = arith.constant 0 : index
    %c0_9 = arith.constant 0 : index
    %14 = vector.load %arg4[%c0_8, %c0_9] : memref<128x32xf32, #tpu.memory_space<vmem>>, vector<128x32xf32>
    tpu.vector_store %arg4[%c0_8, %c0_9], %13 {strides = array<i32>} : memref<128x32xf32, #tpu.memory_space<vmem>>, vector<128x32xf32>,
    return
  }
  func.func @transform_0(%arg0: i32) -> (i32, i32) {
    %c0_i32 = arith.constant 0 : i32
    %c0_i32_0 = arith.constant 0 : i32
    return %arg0, %c0_i32 : i32, i32
  }
  func.func @transform_1(%arg0: i32) -> (i32, i32) {
    %c0_i32 = arith.constant 0 : i32
    %c0_i32_0 = arith.constant 0 : i32
    %c0_i32_1 = arith.constant 0 : i32
    return %c0_i32, %c0_i32_0 : i32, i32
  }
  func.func @transform_2(%arg0: i32) -> (i32, i32) {
    %c0_i32 = arith.constant 0 : i32
    %c0_i32_0 = arith.constant 0 : i32
    %c0_i32_1 = arith.constant 0 : i32
    return %c0_i32, %c0_i32_0 : i32, i32
  }
  func.func @transform_3(%arg0: i32) -> (i32, i32) {
    %c0_i32 = arith.constant 0 : i32
    %c0_i32_0 = arith.constant 0 : i32
    return %arg0, %c0_i32 : i32, i32
  }
}

module attributes {stable_mosaic.version = 11 : i64} {
  func.func @kernel(%arg0: i32, %arg1: memref<128x256xf32, #tpu.memory_space<vmem>>, %arg2: memref<256x32xf32, #tpu.memory_space<vmem>>, %arg3: memref<1x32xf32, #tpu.memory_space<vmem>>, %arg4: memref<128x32xf32, #tpu.memory_space<vmem>>) attributes {dimension_semantics = [#tpu.dimension_semantics<parallel>], iteration_bounds = array<i64: 1>, scalar_prefetch = 0 : i64, scratch_operands = 0 : i64, tpu.core_type = #tpu.core_type<tc>, window_params = [{transform_indices = @transform_0, window_bounds = array<i64: 128, 256>}, {pipeline_mode = #tpu.pipeline_mode<synchronous>, transform_indices = @transform_1, window_bounds = array<i64: 256, 32>}, {pipeline_mode = #tpu.pipeline_mode<synchronous>, transform_indices = @transform_2, window_bounds = array<i64: 1, 32>}, {transform_indices = @transform_3, window_bounds = array<i64: 128, 32>}]} {
    %c0 = arith.constant 0 : index
    %c0_0 = arith.constant 0 : index
    %0 = vector.load %arg1[%c0, %c0_0] : memref<128x256xf32, #tpu.memory_space<vmem>>, vector<128x256xf32>
    %c0_1 = arith.constant 0 : index
    %c0_2 = arith.constant 0 : index
    %1 = vector.load %arg2[%c0_1, %c0_2] : memref<256x32xf32, #tpu.memory_space<vmem>>, vector<256x32xf32>
    %cst = arith.constant dense<0.000000e+00> : vector<128x32xf32>
    %2 = tpu.matmul %0, %1, %cst {dimension_numbers = #tpu.dot_dimension_numbers<[1], [0], [0], [1], [0, 0, 1, 1], [], []>} : vector<128x256xf32>, vector<256x32xf32>, vector<128x32xf32> -> vector<128x32xf32>
    %c0_3 = arith.constant 0 : index
    %c0_4 = arith.constant 0 : index
    %3 = vector.load %arg3[%c0_3, %c0_4] : memref<1x32xf32, #tpu.memory_space<vmem>>, vector<1x32xf32>
    %4 = vector.broadcast %3 : vector<1x32xf32> to vector<128x32xf32>
    %5 = arith.addf %2, %4 : vector<128x32xf32>
    %c0_5 = arith.constant 0 : index
    %c0_6 = arith.constant 0 : index
    %6 = vector.load %arg4[%c0_5, %c0_6] : memref<128x32xf32, #tpu.memory_space<vmem>>, vector<128x32xf32>
    tpu.vector_store %arg4[%c0_5, %c0_6], %5 {strides = array<i32>} : memref<128x32xf32, #tpu.memory_space<vmem>>, vector<128x32xf32>,
    return
  }
  func.func @transform_0(%arg0: i32) -> (i32, i32) {
    %c0_i32 = arith.constant 0 : i32
    %c0_i32_0 = arith.constant 0 : i32
    return %arg0, %c0_i32 : i32, i32
  }
  func.func @transform_1(%arg0: i32) -> (i32, i32) {
    %c0_i32 = arith.constant 0 : i32
    %c0_i32_0 = arith.constant 0 : i32
    %c0_i32_1 = arith.constant 0 : i32
    return %c0_i32, %c0_i32_0 : i32, i32
  }
  func.func @transform_2(%arg0: i32) -> (i32, i32) {
    %c0_i32 = arith.constant 0 : i32
    %c0_i32_0 = arith.constant 0 : i32
    %c0_i32_1 = arith.constant 0 : i32
    return %c0_i32, %c0_i32_0 : i32, i32
  }
  func.func @transform_3(%arg0: i32) -> (i32, i32) {
    %c0_i32 = arith.constant 0 : i32
    %c0_i32_0 = arith.constant 0 : i32
    return %arg0, %c0_i32 : i32, i32
  }
}

</mosaic_0001>

<bundles_post_ra>
// kernel: _lambda_.3
= control target key start
LH: loop header
LB: loop body
LE: loop exit
PB: predicated region body
PF: predicated region fallthrough
CT: control target
= control target key end

     0   :  { %vm222_vm0 = vcmask 261120   ;;  %s547_s1 = inlined_call_operand.vmem [shape: f32[256,32], index: 1, kind: input, shape index: {}]   ;;  %s548_s0 = inlined_call_operand.vmem [shape: f32[64,256], index: 0, kind: input, shape index: {}]   ;;  %s549_s2 = inlined_call_operand.vmem [shape: f32[1,32], index: 2, kind: input, shape index: {}]   ;;  %s550_s3 = inlined_call_operand.vmem [shape: f32[64,32], index: 3, kind: output, shape index: {}]  }
   0x1   :  { %v61_v0 = vld [vmem:[%s547_s1 + $0xf8] sm:$0xff]  ;;  %v60_v2 = vld [vmem:[%s547_s1 + $0xf0] sm:$0xff]  ;;  %v59_v4 = vld [vmem:[%s547_s1 + $0xe8] sm:$0xff] }
   0x2   :  { %v45_v1 = vld [vmem:[%s547_s1 + $0x78] sm:$0xff]  ;;  %244 = vmatprep.subr.mxu0 %v61_v0  ;;  %300 = vmatprep.subr.mxu1 %v61_v0  ;;  %v44_v3 = vld [vmem:[%s547_s1 + $0x70] sm:$0xff]  ;;  %v43_v5 = vld [vmem:[%s547_s1 + $0x68] sm:$0xff] }
   0x3   :  { %245 = vmatpush3.msra.mxu0 %v45_v1  ;;  %316 = vmatpush3.msra.mxu1 %v45_v1  ;;  %v58_v6 = vld [vmem:[%s547_s1 + $0xe0] sm:$0xff]  ;;  %v57_v8 = vld [vmem:[%s547_s1 + $0xd8] sm:$0xff]  ;;  %v56_v10 = vld [vmem:[%s547_s1 + $0xd0] sm:$0xff] }
   0x4   :  { %246 = vmatprep.subr.mxu0 %v60_v2  ;;  %301 = vmatprep.subr.mxu1 %v60_v2  ;;  %v42_v7 = vld [vmem:[%s547_s1 + $0x60] sm:$0xff]  ;;  %v41_v9 = vld [vmem:[%s547_s1 + $0x58] sm:$0xff]  ;;  %v40_v11 = vld [vmem:[%s547_s1 + $0x50] sm:$0xff] }
   0x5   :  { %247 = vmatpush3.msra.mxu0 %v44_v3  ;;  %317 = vmatpush3.msra.mxu1 %v44_v3  ;;  %v55_v12 = vld [vmem:[%s547_s1 + $0xc8] sm:$0xff]  ;;  %v54_v14 = vld [vmem:[%s547_s1 + $0xc0] sm:$0xff]  ;;  %v53_v16 = vld [vmem:[%s547_s1 + $0xb8] sm:$0xff] }
   0x6   :  { %248 = vmatprep.subr.mxu0 %v59_v4  ;;  %302 = vmatprep.subr.mxu1 %v59_v4  ;;  %v39_v13 = vld [vmem:[%s547_s1 + $0x48] sm:$0xff]  ;;  %v38_v15 = vld [vmem:[%s547_s1 + $0x40] sm:$0xff]  ;;  %v37_v17 = vld [vmem:[%s547_s1 + $0x38] sm:$0xff] }
   0x7   :  { %249 = vmatpush3.msra.mxu0 %v43_v5  ;;  %318 = vmatpush3.msra.mxu1 %v43_v5  ;;  %v52_v18 = vld [vmem:[%s547_s1 + $0xb0] sm:$0xff]  ;;  %v51_v20 = vld [vmem:[%s547_s1 + $0xa8] sm:$0xff]  ;;  %v50_v22 = vld [vmem:[%s547_s1 + $0xa0] sm:$0xff] }
   0x8   :  { %250 = vmatprep.subr.mxu0 %v58_v6  ;;  %303 = vmatprep.subr.mxu1 %v58_v6  ;;  %v36_v19 = vld [vmem:[%s547_s1 + $0x30] sm:$0xff]  ;;  %v35_v21 = vld [vmem:[%s547_s1 + $0x28] sm:$0xff]  ;;  %v34_v23 = vld [vmem:[%s547_s1 + $0x20] sm:$0xff] }
   0x9   :  { %251 = vmatpush3.msra.mxu0 %v42_v7  ;;  %319 = vmatpush3.msra.mxu1 %v42_v7  ;;  %v49_v24 = vld [vmem:[%s547_s1 + $0x98] sm:$0xff]  ;;  %v48_v26 = vld [vmem:[%s547_s1 + $0x90] sm:$0xff]  ;;  %v47_v28 = vld [vmem:[%s547_s1 + $0x88] sm:$0xff] }
   0xa   :  { %252 = vmatprep.subr.mxu0 %v57_v8  ;;  %304 = vmatprep.subr.mxu1 %v57_v8  ;;  %v33_v25 = vld [vmem:[%s547_s1 + $0x18] sm:$0xff]  ;;  %v32_v27 = vld [vmem:[%s547_s1 + $0x10] sm:$0xff]  ;;  %v31_v29 = vld [vmem:[%s547_s1 + $0x8] sm:$0xff] }
   0xb   :  { %253 = vmatpush3.msra.mxu0 %v41_v9  ;;  %320 = vmatpush3.msra.mxu1 %v41_v9  ;;  %v46_v30 = vld [vmem:[%s547_s1 + $0x80] sm:$0xff]  ;;  %v15_v32 = vld [vmem:[%s548_s0 + $0x8] sm:$0xff]  ;;  %v17_v36 = vld [vmem:[%s548_s0 + $0x18] sm:$0xff] }
   0xc   :  { %254 = vmatprep.subr.mxu0 %v56_v10  ;;  %305 = vmatprep.subr.mxu1 %v56_v10  ;;  %v30_v31 = vld [vmem:[%s547_s1] sm:$0xff]  ;;  %v23_v33 = vld [vmem:[%s548_s0 + $0x48] sm:$0xff]  ;;  %v25_v37 = vld [vmem:[%s548_s0 + $0x58] sm:$0xff] }
   0xd   :  { %255 = vmatpush3.msra.mxu0 %v40_v11  ;;  %321 = vmatpush3.msra.mxu1 %v40_v11  ;;  %v14_v34 = vld [vmem:[%s548_s0] sm:$0xff]  ;;  %v16_v38 = vld [vmem:[%s548_s0 + $0x10] sm:$0xff]  ;;  %v19_v40 = vld [vmem:[%s548_s0 + $0x28] sm:$0xff] }
   0xe   :  { %256 = vmatprep.subr.mxu0 %v55_v12  ;;  %306 = vmatprep.subr.mxu1 %v55_v12  ;;  %v22_v35 = vld [vmem:[%s548_s0 + $0x40] sm:$0xff]  ;;  %v24_v39 = vld [vmem:[%s548_s0 + $0x50] sm:$0xff]  ;;  %v27_v41 = vld [vmem:[%s548_s0 + $0x68] sm:$0xff] }
   0xf   :  { %257 = vmatpush3.msra.mxu0 %v39_v13  ;;  %322 = vmatpush3.msra.mxu1 %v39_v13  ;;  %v18_v42 = vld [vmem:[%s548_s0 + $0x20] sm:$0xff]  ;;  %v21_v44 = vld [vmem:[%s548_s0 + $0x38] sm:$0xff]  ;;  %v20_v46 = vld [vmem:[%s548_s0 + $0x30] sm:$0xff] }
  0x10   :  { %258 = vmatprep.subr.mxu0 %v54_v14  ;;  %307 = vmatprep.subr.mxu1 %v54_v14  ;;  %v26_v43 = vld [vmem:[%s548_s0 + $0x60] sm:$0xff]  ;;  %v29_v45 = vld [vmem:[%s548_s0 + $0x78] sm:$0xff]  ;;  %v28_v47 = vld [vmem:[%s548_s0 + $0x70] sm:$0xff] }
  0x11   :  { %259 = vmatpush3.msra.mxu0 %v38_v15  ;;  %323 = vmatpush3.msra.mxu1 %v38_v15  ;;  %v235_v50 = vld [vmem:[%s549_s2] ss:$0 sm:$0xff] }
  0x12   :  { %260 = vmatprep.subr.mxu0 %v53_v16  ;;  %308 = vmatprep.subr.mxu1 %v53_v16 }
  0x13   :  { %261 = vmatpush3.msra.mxu0 %v37_v17  ;;  %324 = vmatpush3.msra.mxu1 %v37_v17 }
  0x14   :  { %262 = vmatprep.subr.mxu0 %v52_v18  ;;  %309 = vmatprep.subr.mxu1 %v52_v18 }
  0x15   :  { %263 = vmatpush3.msra.mxu0 %v36_v19  ;;  %325 = vmatpush3.msra.mxu1 %v36_v19 }
  0x16   :  { %264 = vmatprep.subr.mxu0 %v51_v20  ;;  %310 = vmatprep.subr.mxu1 %v51_v20 }
  0x17   :  { %265 = vmatpush3.msra.mxu0 %v35_v21  ;;  %326 = vmatpush3.msra.mxu1 %v35_v21 }
  0x18   :  { %266 = vmatprep.subr.mxu0 %v50_v22  ;;  %311 = vmatprep.subr.mxu1 %v50_v22 }
  0x19   :  { %267 = vmatpush3.msra.mxu0 %v34_v23  ;;  %327 = vmatpush3.msra.mxu1 %v34_v23 }
  0x1a   :  { %268 = vmatprep.subr.mxu0 %v49_v24  ;;  %312 = vmatprep.subr.mxu1 %v49_v24 }
  0x1b   :  { %269 = vmatpush3.msra.mxu0 %v33_v25  ;;  %328 = vmatpush3.msra.mxu1 %v33_v25 }
  0x1c   :  { %270 = vmatprep.subr.mxu0 %v48_v26  ;;  %313 = vmatprep.subr.mxu1 %v48_v26 }
  0x1d   :  { %271 = vmatpush3.msra.mxu0 %v32_v27  ;;  %329 = vmatpush3.msra.mxu1 %v32_v27 }
  0x1e   :  { %272 = vmatprep.subr.mxu0 %v47_v28  ;;  %314 = vmatprep.subr.mxu1 %v47_v28 }
  0x1f   :  { %273 = vmatpush3.msra.mxu0 %v31_v29  ;;  %330 = vmatpush3.msra.mxu1 %v31_v29 }
  0x20   :  { %274 = vmatprep.subr.mxu0 %v46_v30  ;;  %315 = vmatprep.subr.mxu1 %v46_v30 }
  0x21   :  { %275 = vmatpush3.msra.mxu0 %v30_v31  ;;  %331 = vmatpush3.msra.mxu1 %v30_v31 }
  0x22   :  { %133 = vmatprep.mubr.f32.mxu0 %v15_v32  ;;  %153 = vmatprep.mubr.f32.mxu1 %v23_v33 }
  0x23   :  { %134 = vmatmul.mubr.f32.vlgmr.msra.gmra.mxu0 %v14_v34  ;;  %154 = vmatmul.mubr.f32.vlgmr.msra.gmra.mxu1 %v22_v35 }
  0x24   :  { %138 = vmatprep.mubr.f32.mxu0 %v17_v36  ;;  %158 = vmatprep.mubr.f32.mxu1 %v25_v37 }
  0x27   :  { %139 = vmatmul.mubr.f32.gmra.mxu0 %v16_v38  ;;  %159 = vmatmul.mubr.f32.gmra.mxu1 %v24_v39 }
  0x28   :  { %143 = vmatprep.mubr.f32.mxu0 %v19_v40  ;;  %163 = vmatprep.mubr.f32.mxu1 %v27_v41 }
  0x2b   :  { %144 = vmatmul.mubr.f32.gmra.mxu0 %v18_v42  ;;  %164 = vmatmul.mubr.f32.gmra.mxu1 %v26_v43 }
  0x2c   :  { %148 = vmatprep.mubr.f32.mxu0 %v21_v44  ;;  %168 = vmatprep.mubr.f32.mxu1 %v29_v45 }
  0x2f   :  { %149 = vmatmul.mubr.f32.gmra.mxu0 %v20_v46  ;;  %169 = vmatmul.mubr.f32.gmra.mxu1 %v28_v47 }
  0xe3   :  { %v276_v48 = vpop.f32.mrf.mxu0  ;;  %v288_v49 = vpop.f32.mrf.mxu1 }
  0xe5   :  { %v277_v51 = vpop.f32.mrf.mxu0  ;;  %v289_v52 = vpop.f32.mrf.mxu1 }
  0xe6   :  { %v278_v53 = vadd.f32 %v277_v51, %v276_v48  ;;  %v290_v54 = vadd.f32 %v289_v52, %v288_v49 }
  0xe7   :  { %v279_v55 = vpop.f32.mrf.mxu0  ;;  %v291_v56 = vpop.f32.mrf.mxu1 }
  0xe8   :  { %v136_v57 = vadd.f32 %v278_v53, %v235_v50  ;;  %v156_v58 = vadd.f32 %v290_v54, %v235_v50 }
  0xe9   :  { %v280_v59 = vpop.f32.mrf.mxu0  ;;  %v292_v60 = vpop.f32.mrf.mxu1 }
  0xea   :  { %v182_v61 = vmin.f32 %v136_v57, 0.0  ;;  %v186_v62 = vmin.f32 %v156_v58, 0.0  ;;  %v281_v63 = vadd.f32 %v280_v59, %v279_v55  ;;  %v293_v0 = vadd.f32 %v292_v60, %v291_v56 }
  0xeb   :  { %v282_v1 = vpop.f32.mrf.mxu0  ;;  %v294_v2 = vpop.f32.mrf.mxu1  ;;  %vm174_vm1 = vcmp.gt.f32.partialorder %v136_v57, 0.0  ;;  %vm178_vm2 = vcmp.gt.f32.partialorder %v156_v58, 0.0 }
  0xec   :  { %v190_v3 = vmul.f32 1.442695, %v182_v61  ;;  %v198_v4 = vmul.f32 1.442695, %v186_v62  ;;  %v141_v5 = vadd.f32 %v281_v63, %v235_v50  ;;  %v161_v6 = vadd.f32 %v293_v0, %v235_v50 }
  0xed   :  { %v283_v7 = vpop.f32.mrf.mxu0  ;;  %v295_v8 = vpop.f32.mrf.mxu1 }
  0xee   :  { %332 = vpow2.f32 %v190_v3  ;;  %v284_v9 = vadd.f32 %v283_v7, %v282_v1  ;;  %v296_v10 = vadd.f32 %v295_v8, %v294_v2  ;;  %v183_v11 = vmin.f32 %v141_v5, 0.0 }
  0xef   :  { %334 = vpow2.f32 %v198_v4  ;;  %v285_v12 = vpop.f32.mrf.mxu0  ;;  %v297_v13 = vpop.f32.mrf.mxu1  ;;  %v187_v14 = vmin.f32 %v161_v6, 0.0  ;;  %vm175_vm3 = vcmp.gt.f32.partialorder %v141_v5, 0.0  ;;  %vm179_vm4 = vcmp.gt.f32.partialorder %v161_v6, 0.0 }
  0xf0   :  { %v146_v15 = vadd.f32 %v284_v9, %v235_v50  ;;  %v166_v16 = vadd.f32 %v296_v10, %v235_v50  ;;  %v192_v17 = vmul.f32 1.442695, %v183_v11 }
  0xf1   :  { %v286_v18 = vpop.f32.mrf.mxu0  ;;  %v298_v19 = vpop.f32.mrf.mxu1  ;;  %v200_v20 = vmul.f32 1.442695, %v187_v14 }
  0xf2   :  { %v184_v21 = vmin.f32 %v146_v15, 0.0  ;;  %336 = vpow2.f32 %v192_v17  ;;  %v188_v22 = vmin.f32 %v166_v16, 0.0  ;;  %v287_v23 = vadd.f32 %v286_v18, %v285_v12 }
  0xf3   :  { %v299_v24 = vadd.f32 %v298_v19, %v297_v13  ;;  %338 = vpow2.f32 %v200_v20  ;;  %vm176_vm5 = vcmp.gt.f32.partialorder %v146_v15, 0.0  ;;  %vm180_vm6 = vcmp.gt.f32.partialorder %v166_v16, 0.0 }
  0xf4   :  { %v194_v25 = vmul.f32 1.442695, %v184_v21  ;;  %v202_v26 = vmul.f32 1.442695, %v188_v22  ;;  %v151_v27 = vadd.f32 %v287_v23, %v235_v50 }
  0xf5   :  { %v171_v28 = vadd.f32 %v299_v24, %v235_v50 }
  0xf6   :  { %340 = vpow2.f32 %v194_v25  ;;  %v185_v29 = vmin.f32 %v151_v27, 0.0  ;;  %vm177_vm7 = vcmp.gt.f32.partialorder %v151_v27, 0.0 }
  0xf7   :  { %342 = vpow2.f32 %v202_v26  ;;  %v189_v30 = vmin.f32 %v171_v28, 0.0  ;;  %vm181_vm8 = vcmp.gt.f32.partialorder %v171_v28, 0.0 }
  0xf8   :  { %v196_v31 = vmul.f32 1.442695, %v185_v29 }
  0xf9   :  { %v204_v32 = vmul.f32 1.442695, %v189_v30 }
  0xfa   :  { %344 = vpow2.f32 %v196_v31 }
  0xfb   :  { %v333_v33 = vpop.eup %332  ;;  %346 = vpow2.f32 %v204_v32 }
  0xfc   :  { %v335_v34 = vpop.eup %334  ;;  %v236_v35 = vadd.f32 -1.0, %v333_v33 }
  0xfd   :  { %v240_v36 = vadd.f32 -1.0, %v335_v34 }
  0xfe   :  { %v214_v37 = vsel %vm174_vm1, %v136_v57, %v236_v35 }
  0xff   :  { %223 = vst.msk [vmem:[%s550_s3] sm:$0xff] %vm222_vm0, %v214_v37  ;;  %v218_v38 = vsel %vm178_vm2, %v156_v58, %v240_v36  ;;  %v337_v39 = vpop.eup %336 }
 0x100   :  { %227 = vst.msk [vmem:[%s550_s3 + $0x20] sm:$0xff] %vm222_vm0, %v218_v38  ;;  %v339_v40 = vpop.eup %338  ;;  %v237_v41 = vadd.f32 -1.0, %v337_v39 }
 0x101   :  { %v241_v42 = vadd.f32 -1.0, %v339_v40 }
 0x102   :  { %v215_v44 = vsel %vm175_vm3, %v141_v5, %v237_v41 }
 0x103   :  { %v341_v43 = vpop.eup %340  ;;  %224 = vst.msk [vmem:[%s550_s3 + $0x8] sm:$0xff] %vm222_vm0, %v215_v44  ;;  %v219_v46 = vsel %vm179_vm4, %v161_v6, %v241_v42 }
 0x104   :  { %v343_v45 = vpop.eup %342  ;;  %v238_v47 = vadd.f32 -1.0, %v341_v43  ;;  %228 = vst.msk [vmem:[%s550_s3 + $0x28] sm:$0xff] %vm222_vm0, %v219_v46 }
 0x105   :  { %v242_v48 = vadd.f32 -1.0, %v343_v45 }
 0x106   :  { %v216_v49 = vsel %vm176_vm5, %v146_v15, %v238_v47 }
 0x107   :  { %225 = vst.msk [vmem:[%s550_s3 + $0x10] sm:$0xff] %vm222_vm0, %v216_v49  ;;  %v220_v50 = vsel %vm180_vm6, %v166_v16, %v242_v48  ;;  %v345_v51 = vpop.eup %344 }
 0x108   :  { %229 = vst.msk [vmem:[%s550_s3 + $0x30] sm:$0xff] %vm222_vm0, %v220_v50  ;;  %v347_v52 = vpop.eup %346  ;;  %v239_v53 = vadd.f32 -1.0, %v345_v51 }
 0x109   :  { %v243_v54 = vadd.f32 -1.0, %v347_v52 }
 0x10a   :  { %v217_v55 = vsel %vm177_vm7, %v151_v27, %v239_v53 }
 0x10b   :  { %226 = vst.msk [vmem:[%s550_s3 + $0x18] sm:$0xff] %vm222_vm0, %v217_v55  ;;  %v221_v56 = vsel %vm181_vm8, %v171_v28, %v243_v54 }
 0x10c   :  { %230 = vst.msk [vmem:[%s550_s3 + $0x38] sm:$0xff] %vm222_vm0, %v221_v56 }

// kernel: _lambda_.4
= control target key start
LH: loop header
LB: loop body
LE: loop exit
PB: predicated region body
PF: predicated region fallthrough
CT: control target
= control target key end

     0   :  { %vm326_vm1 = vcmask 261120   ;;  %s877_s1 = inlined_call_operand.vmem [shape: f32[256,32], index: 1, kind: input, shape index: {}]   ;;  %s878_s0 = inlined_call_operand.vmem [shape: f32[128,256], index: 0, kind: input, shape index: {}]   ;;  %s879_s2 = inlined_call_operand.vmem [shape: f32[1,32], index: 2, kind: input, shape index: {}]   ;;  %s880_s3 = inlined_call_operand.vmem [shape: f32[128,32], index: 3, kind: output, shape index: {}]  }
   0x1   :  { %v77_v0 = vld [vmem:[%s877_s1 + $0xf8] sm:$0xff]  ;;  %v76_v2 = vld [vmem:[%s877_s1 + $0xf0] sm:$0xff]  ;;  %v75_v4 = vld [vmem:[%s877_s1 + $0xe8] sm:$0xff] }
   0x2   :  { %v61_v1 = vld [vmem:[%s877_s1 + $0x78] sm:$0xff]  ;;  %364 = vmatprep.subr.mxu0 %v77_v0  ;;  %444 = vmatprep.subr.mxu1 %v77_v0  ;;  %v60_v3 = vld [vmem:[%s877_s1 + $0x70] sm:$0xff]  ;;  %v59_v5 = vld [vmem:[%s877_s1 + $0x68] sm:$0xff] }
   0x3   :  { %365 = vmatpush3.msra.mxu0 %v61_v1  ;;  %460 = vmatpush3.msra.mxu1 %v61_v1  ;;  %v74_v6 = vld [vmem:[%s877_s1 + $0xe0] sm:$0xff]  ;;  %v73_v8 = vld [vmem:[%s877_s1 + $0xd8] sm:$0xff]  ;;  %v72_v10 = vld [vmem:[%s877_s1 + $0xd0] sm:$0xff] }
   0x4   :  { %366 = vmatprep.subr.mxu0 %v76_v2  ;;  %445 = vmatprep.subr.mxu1 %v76_v2  ;;  %v58_v7 = vld [vmem:[%s877_s1 + $0x60] sm:$0xff]  ;;  %v57_v9 = vld [vmem:[%s877_s1 + $0x58] sm:$0xff]  ;;  %v56_v11 = vld [vmem:[%s877_s1 + $0x50] sm:$0xff] }
   0x5   :  { %367 = vmatpush3.msra.mxu0 %v60_v3  ;;  %461 = vmatpush3.msra.mxu1 %v60_v3  ;;  %v71_v12 = vld [vmem:[%s877_s1 + $0xc8] sm:$0xff]  ;;  %v70_v14 = vld [vmem:[%s877_s1 + $0xc0] sm:$0xff]  ;;  %v69_v16 = vld [vmem:[%s877_s1 + $0xb8] sm:$0xff] }
   0x6   :  { %368 = vmatprep.subr.mxu0 %v75_v4  ;;  %446 = vmatprep.subr.mxu1 %v75_v4  ;;  %v55_v13 = vld [vmem:[%s877_s1 + $0x48] sm:$0xff]  ;;  %v54_v15 = vld [vmem:[%s877_s1 + $0x40] sm:$0xff]  ;;  %v53_v17 = vld [vmem:[%s877_s1 + $0x38] sm:$0xff] }
   0x7   :  { %369 = vmatpush3.msra.mxu0 %v59_v5  ;;  %462 = vmatpush3.msra.mxu1 %v59_v5  ;;  %v68_v18 = vld [vmem:[%s877_s1 + $0xb0] sm:$0xff]  ;;  %v67_v20 = vld [vmem:[%s877_s1 + $0xa8] sm:$0xff]  ;;  %v66_v22 = vld [vmem:[%s877_s1 + $0xa0] sm:$0xff] }
   0x8   :  { %370 = vmatprep.subr.mxu0 %v74_v6  ;;  %447 = vmatprep.subr.mxu1 %v74_v6  ;;  %v52_v19 = vld [vmem:[%s877_s1 + $0x30] sm:$0xff]  ;;  %v51_v21 = vld [vmem:[%s877_s1 + $0x28] sm:$0xff]  ;;  %v50_v23 = vld [vmem:[%s877_s1 + $0x20] sm:$0xff] }
   0x9   :  { %371 = vmatpush3.msra.mxu0 %v58_v7  ;;  %463 = vmatpush3.msra.mxu1 %v58_v7  ;;  %v65_v24 = vld [vmem:[%s877_s1 + $0x98] sm:$0xff]  ;;  %v64_v26 = vld [vmem:[%s877_s1 + $0x90] sm:$0xff]  ;;  %v63_v28 = vld [vmem:[%s877_s1 + $0x88] sm:$0xff] }
   0xa   :  { %372 = vmatprep.subr.mxu0 %v73_v8  ;;  %448 = vmatprep.subr.mxu1 %v73_v8  ;;  %v49_v25 = vld [vmem:[%s877_s1 + $0x18] sm:$0xff]  ;;  %v48_v27 = vld [vmem:[%s877_s1 + $0x10] sm:$0xff]  ;;  %v47_v29 = vld [vmem:[%s877_s1 + $0x8] sm:$0xff] }
   0xb   :  { %373 = vmatpush3.msra.mxu0 %v57_v9  ;;  %464 = vmatpush3.msra.mxu1 %v57_v9  ;;  %v62_v30 = vld [vmem:[%s877_s1 + $0x80] sm:$0xff]  ;;  %v15_v32 = vld [vmem:[%s878_s0 + $0x8] sm:$0xff]  ;;  %v17_v36 = vld [vmem:[%s878_s0 + $0x18] sm:$0xff] }
   0xc   :  { %374 = vmatprep.subr.mxu0 %v72_v10  ;;  %449 = vmatprep.subr.mxu1 %v72_v10  ;;  %v46_v31 = vld [vmem:[%s877_s1] sm:$0xff]  ;;  %v31_v33 = vld [vmem:[%s878_s0 + $0x88] sm:$0xff]  ;;  %v33_v37 = vld [vmem:[%s878_s0 + $0x98] sm:$0xff] }
   0xd   :  { %375 = vmatpush3.msra.mxu0 %v56_v11  ;;  %465 = vmatpush3.msra.mxu1 %v56_v11  ;;  %v14_v34 = vld [vmem:[%s878_s0] sm:$0xff]  ;;  %v16_v38 = vld [vmem:[%s878_s0 + $0x10] sm:$0xff]  ;;  %v19_v40 = vld [vmem:[%s878_s0 + $0x28] sm:$0xff] }
   0xe   :  { %376 = vmatprep.subr.mxu0 %v71_v12  ;;  %450 = vmatprep.subr.mxu1 %v71_v12  ;;  %v30_v35 = vld [vmem:[%s878_s0 + $0x80] sm:$0xff]  ;;  %v32_v39 = vld [vmem:[%s878_s0 + $0x90] sm:$0xff]  ;;  %v35_v41 = vld [vmem:[%s878_s0 + $0xa8] sm:$0xff] }
   0xf   :  { %377 = vmatpush3.msra.mxu0 %v55_v13  ;;  %466 = vmatpush3.msra.mxu1 %v55_v13  ;;  %v18_v42 = vld [vmem:[%s878_s0 + $0x20] sm:$0xff]  ;;  %v21_v44 = vld [vmem:[%s878_s0 + $0x38] sm:$0xff]  ;;  %v20_v46 = vld [vmem:[%s878_s0 + $0x30] sm:$0xff] }
  0x10   :  { %378 = vmatprep.subr.mxu0 %v70_v14  ;;  %451 = vmatprep.subr.mxu1 %v70_v14  ;;  %v34_v43 = vld [vmem:[%s878_s0 + $0xa0] sm:$0xff]  ;;  %v37_v45 = vld [vmem:[%s878_s0 + $0xb8] sm:$0xff]  ;;  %v36_v47 = vld [vmem:[%s878_s0 + $0xb0] sm:$0xff] }
  0x11   :  { %379 = vmatpush3.msra.mxu0 %v54_v15  ;;  %467 = vmatpush3.msra.mxu1 %v54_v15  ;;  %v23_v48 = vld [vmem:[%s878_s0 + $0x48] sm:$0xff]  ;;  %v22_v50 = vld [vmem:[%s878_s0 + $0x40] sm:$0xff]  ;;  %v25_v52 = vld [vmem:[%s878_s0 + $0x58] sm:$0xff] }
  0x12   :  { %380 = vmatprep.subr.mxu0 %v69_v16  ;;  %452 = vmatprep.subr.mxu1 %v69_v16  ;;  %v39_v49 = vld [vmem:[%s878_s0 + $0xc8] sm:$0xff]  ;;  %v38_v51 = vld [vmem:[%s878_s0 + $0xc0] sm:$0xff]  ;;  %v41_v53 = vld [vmem:[%s878_s0 + $0xd8] sm:$0xff] }
  0x13   :  { %381 = vmatpush3.msra.mxu0 %v53_v17  ;;  %468 = vmatpush3.msra.mxu1 %v53_v17  ;;  %v24_v54 = vld [vmem:[%s878_s0 + $0x50] sm:$0xff]  ;;  %v27_v56 = vld [vmem:[%s878_s0 + $0x68] sm:$0xff]  ;;  %v26_v58 = vld [vmem:[%s878_s0 + $0x60] sm:$0xff] }
  0x14   :  { %382 = vmatprep.subr.mxu0 %v68_v18  ;;  %453 = vmatprep.subr.mxu1 %v68_v18  ;;  %v40_v55 = vld [vmem:[%s878_s0 + $0xd0] sm:$0xff]  ;;  %v43_v57 = vld [vmem:[%s878_s0 + $0xe8] sm:$0xff]  ;;  %v42_v59 = vld [vmem:[%s878_s0 + $0xe0] sm:$0xff] }
  0x15   :  { %383 = vmatpush3.msra.mxu0 %v52_v19  ;;  %469 = vmatpush3.msra.mxu1 %v52_v19  ;;  %v29_v60 = vld [vmem:[%s878_s0 + $0x78] sm:$0xff]  ;;  %v28_v62 = vld [vmem:[%s878_s0 + $0x70] sm:$0xff]  ;;  %v723_v2 = vld [vmem:[%s879_s2] ss:$0 sm:$0xff] }
  0x16   :  { %384 = vmatprep.subr.mxu0 %v67_v20  ;;  %454 = vmatprep.subr.mxu1 %v67_v20  ;;  %v45_v61 = vld [vmem:[%s878_s0 + $0xf8] sm:$0xff]  ;;  %v44_v63 = vld [vmem:[%s878_s0 + $0xf0] sm:$0xff] }
  0x17   :  { %385 = vmatpush3.msra.mxu0 %v51_v21  ;;  %470 = vmatpush3.msra.mxu1 %v51_v21 }
  0x18   :  { %386 = vmatprep.subr.mxu0 %v66_v22  ;;  %455 = vmatprep.subr.mxu1 %v66_v22 }
  0x19   :  { %387 = vmatpush3.msra.mxu0 %v50_v23  ;;  %471 = vmatpush3.msra.mxu1 %v50_v23 }
  0x1a   :  { %388 = vmatprep.subr.mxu0 %v65_v24  ;;  %456 = vmatprep.subr.mxu1 %v65_v24 }
  0x1b   :  { %389 = vmatpush3.msra.mxu0 %v49_v25  ;;  %472 = vmatpush3.msra.mxu1 %v49_v25 }
  0x1c   :  { %390 = vmatprep.subr.mxu0 %v64_v26  ;;  %457 = vmatprep.subr.mxu1 %v64_v26 }
  0x1d   :  { %391 = vmatpush3.msra.mxu0 %v48_v27  ;;  %473 = vmatpush3.msra.mxu1 %v48_v27 }
  0x1e   :  { %392 = vmatprep.subr.mxu0 %v63_v28  ;;  %458 = vmatprep.subr.mxu1 %v63_v28 }
  0x1f   :  { %393 = vmatpush3.msra.mxu0 %v47_v29  ;;  %474 = vmatpush3.msra.mxu1 %v47_v29 }
  0x20   :  { %394 = vmatprep.subr.mxu0 %v62_v30  ;;  %459 = vmatprep.subr.mxu1 %v62_v30 }
  0x21   :  { %395 = vmatpush3.msra.mxu0 %v46_v31  ;;  %475 = vmatpush3.msra.mxu1 %v46_v31 }
  0x22   :  { %149 = vmatprep.mubr.f32.mxu0 %v15_v32  ;;  %189 = vmatprep.mubr.f32.mxu1 %v31_v33 }
  0x23   :  { %150 = vmatmul.mubr.f32.vlgmr.msra.gmra.mxu0 %v14_v34  ;;  %190 = vmatmul.mubr.f32.vlgmr.msra.gmra.mxu1 %v30_v35 }
  0x24   :  { %154 = vmatprep.mubr.f32.mxu0 %v17_v36  ;;  %194 = vmatprep.mubr.f32.mxu1 %v33_v37 }
  0x27   :  { %155 = vmatmul.mubr.f32.gmra.mxu0 %v16_v38  ;;  %195 = vmatmul.mubr.f32.gmra.mxu1 %v32_v39 }
  0x28   :  { %159 = vmatprep.mubr.f32.mxu0 %v19_v40  ;;  %199 = vmatprep.mubr.f32.mxu1 %v35_v41 }
  0x2b   :  { %160 = vmatmul.mubr.f32.gmra.mxu0 %v18_v42  ;;  %200 = vmatmul.mubr.f32.gmra.mxu1 %v34_v43 }
  0x2c   :  { %164 = vmatprep.mubr.f32.mxu0 %v21_v44  ;;  %204 = vmatprep.mubr.f32.mxu1 %v37_v45 }
  0x2f   :  { %165 = vmatmul.mubr.f32.gmra.mxu0 %v20_v46  ;;  %205 = vmatmul.mubr.f32.gmra.mxu1 %v36_v47 }
  0x30   :  { %169 = vmatprep.mubr.f32.mxu0 %v23_v48  ;;  %209 = vmatprep.mubr.f32.mxu1 %v39_v49 }
  0x33   :  { %170 = vmatmul.mubr.f32.gmra.mxu0 %v22_v50  ;;  %210 = vmatmul.mubr.f32.gmra.mxu1 %v38_v51 }
  0x34   :  { %174 = vmatprep.mubr.f32.mxu0 %v25_v52  ;;  %214 = vmatprep.mubr.f32.mxu1 %v41_v53 }
  0x37   :  { %175 = vmatmul.mubr.f32.gmra.mxu0 %v24_v54  ;;  %215 = vmatmul.mubr.f32.gmra.mxu1 %v40_v55 }
  0x38   :  { %179 = vmatprep.mubr.f32.mxu0 %v27_v56  ;;  %219 = vmatprep.mubr.f32.mxu1 %v43_v57 }
  0x3b   :  { %180 = vmatmul.mubr.f32.gmra.mxu0 %v26_v58  ;;  %220 = vmatmul.mubr.f32.gmra.mxu1 %v42_v59 }
  0x3c   :  { %184 = vmatprep.mubr.f32.mxu0 %v29_v60  ;;  %224 = vmatprep.mubr.f32.mxu1 %v45_v61 }
  0x3f   :  { %185 = vmatmul.mubr.f32.gmra.mxu0 %v28_v62  ;;  %225 = vmatmul.mubr.f32.gmra.mxu1 %v44_v63 }
  0xe3   :  { %v396_v0 = vpop.f32.mrf.mxu0  ;;  %v420_v1 = vpop.f32.mrf.mxu1 }
  0xe5   :  { %v397_v3 = vpop.f32.mrf.mxu0  ;;  %v421_v4 = vpop.f32.mrf.mxu1 }
  0xe6   :  { %v398_v5 = vadd.f32 %v397_v3, %v396_v0  ;;  %v422_v6 = vadd.f32 %v421_v4, %v420_v1 }
  0xe7   :  { %v399_v7 = vpop.f32.mrf.mxu0  ;;  %v423_v8 = vpop.f32.mrf.mxu1 }
  0xe8   :  { %v726_v9 = vadd.f32 %v398_v5, %v723_v2  ;;  %v729_v10 = vadd.f32 %v422_v6, %v723_v2 }
  0xe9   :  { %v400_v11 = vpop.f32.mrf.mxu0  ;;  %v424_v12 = vpop.f32.mrf.mxu1 }
  0xea   :  { %v246_v13 = vmin.f32 %v726_v9, 0.0  ;;  %v254_v14 = vmin.f32 %v729_v10, 0.0  ;;  %v401_v15 = vadd.f32 %v400_v11, %v399_v7  ;;  %v425_v16 = vadd.f32 %v424_v12, %v423_v8 }
  0xeb   :  { %v402_v17 = vpop.f32.mrf.mxu0  ;;  %v426_v18 = vpop.f32.mrf.mxu1  ;;  %vm230_vm0 = vcmp.gt.f32.partialorder %v726_v9, 0.0  ;;  %vm238_vm2 = vcmp.gt.f32.partialorder %v729_v10, 0.0 }
  0xec   :  { %v262_v19 = vmul.f32 1.442695, %v246_v13  ;;  %v278_v20 = vmul.f32 1.442695, %v254_v14  ;;  %v734_v21 = vadd.f32 %v401_v15, %v723_v2  ;;  %v737_v22 = vadd.f32 %v425_v16, %v723_v2 }
  0xed   :  { %v403_v23 = vpop.f32.mrf.mxu0  ;;  %v427_v24 = vpop.f32.mrf.mxu1 }
  0xee   :  { %476 = vpow2.f32 %v262_v19  ;;  %v404_v25 = vadd.f32 %v403_v23, %v402_v17  ;;  %v428_v26 = vadd.f32 %v427_v24, %v426_v18  ;;  %v247_v27 = vmin.f32 %v734_v21, 0.0 }
  0xef   :  { %478 = vpow2.f32 %v278_v20  ;;  %v405_v28 = vpop.f32.mrf.mxu0  ;;  %v429_v29 = vpop.f32.mrf.mxu1  ;;  %v255_v30 = vmin.f32 %v737_v22, 0.0  ;;  %vm231_vm3 = vcmp.gt.f32.partialorder %v734_v21, 0.0  ;;  %vm239_vm4 = vcmp.gt.f32.partialorder %v737_v22, 0.0 }
  0xf0   :  { %v742_v31 = vadd.f32 %v404_v25, %v723_v2  ;;  %v745_v32 = vadd.f32 %v428_v26, %v723_v2  ;;  %v264_v33 = vmul.f32 1.442695, %v247_v27 }
  0xf1   :  { %v406_v34 = vpop.f32.mrf.mxu0  ;;  %v430_v35 = vpop.f32.mrf.mxu1  ;;  %v280_v36 = vmul.f32 1.442695, %v255_v30 }
  0xf2   :  { %v248_v37 = vmin.f32 %v742_v31, 0.0  ;;  %480 = vpow2.f32 %v264_v33  ;;  %v256_v38 = vmin.f32 %v745_v32, 0.0  ;;  %v407_v39 = vadd.f32 %v406_v34, %v405_v28 }
  0xf3   :  { %v431_v40 = vadd.f32 %v430_v35, %v429_v29  ;;  %v408_v41 = vpop.f32.mrf.mxu0  ;;  %v432_v42 = vpop.f32.mrf.mxu1  ;;  %482 = vpow2.f32 %v280_v36  ;;  %vm232_vm5 = vcmp.gt.f32.partialorder %v742_v31, 0.0  ;;  %vm240_vm6 = vcmp.gt.f32.partialorder %v745_v32, 0.0 }
  0xf4   :  { %v266_v43 = vmul.f32 1.442695, %v248_v37  ;;  %v282_v44 = vmul.f32 1.442695, %v256_v38  ;;  %v750_v45 = vadd.f32 %v407_v39, %v723_v2 }
  0xf5   :  { %v753_v46 = vadd.f32 %v431_v40, %v723_v2  ;;  %v409_v47 = vpop.f32.mrf.mxu0  ;;  %v433_v48 = vpop.f32.mrf.mxu1 }
  0xf6   :  { %484 = vpow2.f32 %v266_v43  ;;  %v410_v49 = vadd.f32 %v409_v47, %v408_v41  ;;  %v434_v50 = vadd.f32 %v433_v48, %v432_v42  ;;  %v249_v51 = vmin.f32 %v750_v45, 0.0 }
  0xf7   :  { %486 = vpow2.f32 %v282_v44  ;;  %v411_v52 = vpop.f32.mrf.mxu0  ;;  %v435_v53 = vpop.f32.mrf.mxu1  ;;  %v257_v54 = vmin.f32 %v753_v46, 0.0  ;;  %vm233_vm7 = vcmp.gt.f32.partialorder %v750_v45, 0.0  ;;  %vm241_vm8 = vcmp.gt.f32.partialorder %v753_v46, 0.0 }
  0xf8   :  { %v758_v55 = vadd.f32 %v410_v49, %v723_v2  ;;  %v761_v56 = vadd.f32 %v434_v50, %v723_v2  ;;  %v268_v57 = vmul.f32 1.442695, %v249_v51 }
  0xf9   :  { %v412_v58 = vpop.f32.mrf.mxu0  ;;  %v436_v59 = vpop.f32.mrf.mxu1  ;;  %v284_v60 = vmul.f32 1.442695, %v257_v54 }
  0xfa   :  { %v250_v61 = vmin.f32 %v758_v55, 0.0  ;;  %488 = vpow2.f32 %v268_v57  ;;  %v258_v63 = vmin.f32 %v761_v56, 0.0  ;;  %v413_v0 = vadd.f32 %v412_v58, %v411_v52 }
  0xfb   :  { %v477_v62 = vpop.eup %476  ;;  %v437_v1 = vadd.f32 %v436_v59, %v435_v53  ;;  %v414_v3 = vpop.f32.mrf.mxu0  ;;  %490 = vpow2.f32 %v284_v60  ;;  %vm234_vm9 = vcmp.gt.f32.partialorder %v758_v55, 0.0  ;;  %vm242_vm10 = vcmp.gt.f32.partialorder %v761_v56, 0.0 }
  0xfc   :  { %v438_v4 = vpop.f32.mrf.mxu1  ;;  %v479_v5 = vpop.eup %478  ;;  %v348_v6 = vadd.f32 -1.0, %v477_v62  ;;  %v270_v7 = vmul.f32 1.442695, %v250_v61  ;;  %v286_v11 = vmul.f32 1.442695, %v258_v63  ;;  %v768_v12 = vadd.f32 %v413_v0, %v723_v2 }
  0xfd   :  { %v356_v8 = vadd.f32 -1.0, %v479_v5  ;;  %v771_v13 = vadd.f32 %v437_v1, %v723_v2  ;;  %v415_v14 = vpop.f32.mrf.mxu0 }
  0xfe   :  { %v439_v15 = vpop.f32.mrf.mxu1  ;;  %v310_v16 = vsel %vm230_vm0, %v726_v9, %v348_v6  ;;  %492 = vpow2.f32 %v270_v7  ;;  %v416_v17 = vadd.f32 %v415_v14, %v414_v3  ;;  %v251_v20 = vmin.f32 %v768_v12, 0.0 }
  0xff   :  { %v440_v18 = vadd.f32 %v439_v15, %v438_v4  ;;  %327 = vst.msk [vmem:[%s880_s3] sm:$0xff] %vm326_vm1, %v310_v16  ;;  %v318_v19 = vsel %vm238_vm2, %v729_v10, %v356_v8  ;;  %494 = vpow2.f32 %v286_v11  ;;  %v417_v23 = vpop.f32.mrf.mxu0  ;;  %v481_v25 = vpop.eup %480  ;;  %v259_v9 = vmin.f32 %v771_v13, 0.0 }
 0x100   :  { %v441_v24 = vpop.f32.mrf.mxu1  ;;  %335 = vst.msk [vmem:[%s880_s3 + $0x40] sm:$0xff] %vm326_vm1, %v318_v19  ;;  %v788_v26 = vadd.f32 %v416_v17, %v723_v2  ;;  %v483_v10 = vpop.eup %482  ;;  %v349_v28 = vadd.f32 -1.0, %v481_v25  ;;  %v272_v29 = vmul.f32 1.442695, %v251_v20  ;;  %vm235_vm11 = vcmp.gt.f32.partialorder %v768_v12, 0.0 }
 0x101   :  { %v791_v27 = vadd.f32 %v440_v18, %v723_v2  ;;  %v357_v30 = vadd.f32 -1.0, %v483_v10  ;;  %v288_v33 = vmul.f32 1.442695, %v259_v9  ;;  %v418_v35 = vpop.f32.mrf.mxu0  ;;  %vm243_vm12 = vcmp.gt.f32.partialorder %v771_v13, 0.0 }
 0x102   :  { %v252_v34 = vmin.f32 %v788_v26, 0.0  ;;  %v442_v36 = vpop.f32.mrf.mxu1  ;;  %v311_v38 = vsel %vm231_vm3, %v734_v21, %v349_v28  ;;  %496 = vpow2.f32 %v272_v29  ;;  %v419_v47 = vadd.f32 %v418_v35, %v417_v23 }
 0x103   :  { %v485_v37 = vpop.eup %484  ;;  %v260_v39 = vmin.f32 %v791_v27, 0.0  ;;  %328 = vst.msk [vmem:[%s880_s3 + $0x8] sm:$0xff] %vm326_vm1, %v311_v38  ;;  %v319_v41 = vsel %vm239_vm4, %v737_v22, %v357_v30  ;;  %498 = vpow2.f32 %v288_v33  ;;  %v443_v48 = vadd.f32 %v442_v36, %v441_v24 }
 0x104   :  { %v487_v40 = vpop.eup %486  ;;  %v350_v42 = vadd.f32 -1.0, %v485_v37  ;;  %v274_v43 = vmul.f32 1.442695, %v252_v34  ;;  %336 = vst.msk [vmem:[%s880_s3 + $0x48] sm:$0xff] %vm326_vm1, %v319_v41  ;;  %v187_v50 = vadd.f32 %v419_v47, %v723_v2  ;;  %vm236_vm13 = vcmp.gt.f32.partialorder %v788_v26, 0.0 }
 0x105   :  { %v358_v21 = vadd.f32 -1.0, %v487_v40  ;;  %v290_v44 = vmul.f32 1.442695, %v260_v39  ;;  %v227_v51 = vadd.f32 %v443_v48, %v723_v2  ;;  %vm244_vm14 = vcmp.gt.f32.partialorder %v791_v27, 0.0 }
 0x106   :  { %v312_v49 = vsel %vm232_vm5, %v742_v31, %v350_v42  ;;  %500 = vpow2.f32 %v274_v43  ;;  %v253_v54 = vmin.f32 %v187_v50, 0.0  ;;  %vm237_vm15 = vcmp.gt.f32.partialorder %v187_v50, 0.0 }
 0x107   :  { %329 = vst.msk [vmem:[%s880_s3 + $0x10] sm:$0xff] %vm326_vm1, %v312_v49  ;;  %v320_v22 = vsel %vm240_vm6, %v745_v32, %v358_v21  ;;  %502 = vpow2.f32 %v290_v44  ;;  %v489_v52 = vpop.eup %488  ;;  %v261_v58 = vmin.f32 %v227_v51, 0.0  ;;  %vm245_vm0 = vcmp.gt.f32.partialorder %v227_v51, 0.0 }
 0x108   :  { %337 = vst.msk [vmem:[%s880_s3 + $0x50] sm:$0xff] %vm326_vm1, %v320_v22  ;;  %v491_v31 = vpop.eup %490  ;;  %v351_v53 = vadd.f32 -1.0, %v489_v52  ;;  %v276_v60 = vmul.f32 1.442695, %v253_v54 }
 0x109   :  { %v359_v57 = vadd.f32 -1.0, %v491_v31  ;;  %v292_v63 = vmul.f32 1.442695, %v261_v58 }
 0x10a   :  { %v313_v32 = vsel %vm233_vm7, %v750_v45, %v351_v53  ;;  %504 = vpow2.f32 %v276_v60 }
 0x10b   :  { %v493_v59 = vpop.eup %492  ;;  %330 = vst.msk [vmem:[%s880_s3 + $0x18] sm:$0xff] %vm326_vm1, %v313_v32  ;;  %v321_v61 = vsel %vm241_vm8, %v753_v46, %v359_v57  ;;  %506 = vpow2.f32 %v292_v63 }
 0x10c   :  { %v495_v2 = vpop.eup %494  ;;  %v352_v62 = vadd.f32 -1.0, %v493_v59  ;;  %338 = vst.msk [vmem:[%s880_s3 + $0x58] sm:$0xff] %vm326_vm1, %v321_v61 }
 0x10d   :  { %v360_v45 = vadd.f32 -1.0, %v495_v2 }
 0x10e   :  { %v314_v0 = vsel %vm234_vm9, %v758_v55, %v352_v62 }
 0x10f   :  { %331 = vst.msk [vmem:[%s880_s3 + $0x20] sm:$0xff] %vm326_vm1, %v314_v0  ;;  %v322_v46 = vsel %vm242_vm10, %v761_v56, %v360_v45  ;;  %v497_v1 = vpop.eup %496 }
 0x110   :  { %339 = vst.msk [vmem:[%s880_s3 + $0x60] sm:$0xff] %vm326_vm1, %v322_v46  ;;  %v499_v3 = vpop.eup %498  ;;  %v353_v4 = vadd.f32 -1.0, %v497_v1 }
 0x111   :  { %v361_v55 = vadd.f32 -1.0, %v499_v3 }
 0x112   :  { %v315_v6 = vsel %vm235_vm11, %v768_v12, %v353_v4 }
 0x113   :  { %v501_v5 = vpop.eup %500  ;;  %332 = vst.msk [vmem:[%s880_s3 + $0x28] sm:$0xff] %vm326_vm1, %v315_v6  ;;  %v323_v56 = vsel %vm243_vm12, %v771_v13, %v361_v55 }
 0x114   :  { %v503_v7 = vpop.eup %502  ;;  %v354_v8 = vadd.f32 -1.0, %v501_v5  ;;  %340 = vst.msk [vmem:[%s880_s3 + $0x68] sm:$0xff] %vm326_vm1, %v323_v56 }
 0x115   :  { %v362_v11 = vadd.f32 -1.0, %v503_v7 }
 0x116   :  { %v316_v12 = vsel %vm236_vm13, %v788_v26, %v354_v8 }
 0x117   :  { %333 = vst.msk [vmem:[%s880_s3 + $0x30] sm:$0xff] %vm326_vm1, %v316_v12  ;;  %v324_v13 = vsel %vm244_vm14, %v791_v27, %v362_v11  ;;  %v505_v14 = vpop.eup %504 }
 0x118   :  { %341 = vst.msk [vmem:[%s880_s3 + $0x70] sm:$0xff] %vm326_vm1, %v324_v13  ;;  %v507_v15 = vpop.eup %506  ;;  %v355_v16 = vadd.f32 -1.0, %v505_v14 }
 0x119   :  { %v363_v17 = vadd.f32 -1.0, %v507_v15 }
 0x11a   :  { %v317_v18 = vsel %vm237_vm15, %v187_v50, %v355_v16 }
 0x11b   :  { %334 = vst.msk [vmem:[%s880_s3 + $0x38] sm:$0xff] %vm326_vm1, %v317_v18  ;;  %v325_v19 = vsel %vm245_vm0, %v227_v51, %v363_v17 }
 0x11c   :  { %342 = vst.msk [vmem:[%s880_s3 + $0x78] sm:$0xff] %vm326_vm1, %v325_v19 }

// kernel: _lambda_.5
= control target key start
LH: loop header
LB: loop body
LE: loop exit
PB: predicated region body
PF: predicated region fallthrough
CT: control target
= control target key end

     0   :  { %vm230_vm0 = vcmask 261120   ;;  %s661_s1 = inlined_call_operand.vmem [shape: f32[256,32], index: 1, kind: input, shape index: {}]   ;;  %s662_s0 = inlined_call_operand.vmem [shape: f32[128,256], index: 0, kind: input, shape index: {}]   ;;  %s663_s2 = inlined_call_operand.vmem [shape: f32[1,32], index: 2, kind: input, shape index: {}]   ;;  %s664_s3 = inlined_call_operand.vmem [shape: f32[128,32], index: 3, kind: output, shape index: {}]  }
   0x1   :  { %v77_v0 = vld [vmem:[%s661_s1 + $0xf8] sm:$0xff]  ;;  %v76_v2 = vld [vmem:[%s661_s1 + $0xf0] sm:$0xff]  ;;  %v75_v4 = vld [vmem:[%s661_s1 + $0xe8] sm:$0xff] }
   0x2   :  { %v61_v1 = vld [vmem:[%s661_s1 + $0x78] sm:$0xff]  ;;  %252 = vmatprep.subr.mxu0 %v77_v0  ;;  %332 = vmatprep.subr.mxu1 %v77_v0  ;;  %v60_v3 = vld [vmem:[%s661_s1 + $0x70] sm:$0xff]  ;;  %v59_v5 = vld [vmem:[%s661_s1 + $0x68] sm:$0xff] }
   0x3   :  { %253 = vmatpush3.msra.mxu0 %v61_v1  ;;  %348 = vmatpush3.msra.mxu1 %v61_v1  ;;  %v74_v6 = vld [vmem:[%s661_s1 + $0xe0] sm:$0xff]  ;;  %v73_v8 = vld [vmem:[%s661_s1 + $0xd8] sm:$0xff]  ;;  %v72_v10 = vld [vmem:[%s661_s1 + $0xd0] sm:$0xff] }
   0x4   :  { %254 = vmatprep.subr.mxu0 %v76_v2  ;;  %333 = vmatprep.subr.mxu1 %v76_v2  ;;  %v58_v7 = vld [vmem:[%s661_s1 + $0x60] sm:$0xff]  ;;  %v57_v9 = vld [vmem:[%s661_s1 + $0x58] sm:$0xff]  ;;  %v56_v11 = vld [vmem:[%s661_s1 + $0x50] sm:$0xff] }
   0x5   :  { %255 = vmatpush3.msra.mxu0 %v60_v3  ;;  %349 = vmatpush3.msra.mxu1 %v60_v3  ;;  %v71_v12 = vld [vmem:[%s661_s1 + $0xc8] sm:$0xff]  ;;  %v70_v14 = vld [vmem:[%s661_s1 + $0xc0] sm:$0xff]  ;;  %v69_v16 = vld [vmem:[%s661_s1 + $0xb8] sm:$0xff] }
   0x6   :  { %256 = vmatprep.subr.mxu0 %v75_v4  ;;  %334 = vmatprep.subr.mxu1 %v75_v4  ;;  %v55_v13 = vld [vmem:[%s661_s1 + $0x48] sm:$0xff]  ;;  %v54_v15 = vld [vmem:[%s661_s1 + $0x40] sm:$0xff]  ;;  %v53_v17 = vld [vmem:[%s661_s1 + $0x38] sm:$0xff] }
   0x7   :  { %257 = vmatpush3.msra.mxu0 %v59_v5  ;;  %350 = vmatpush3.msra.mxu1 %v59_v5  ;;  %v68_v18 = vld [vmem:[%s661_s1 + $0xb0] sm:$0xff]  ;;  %v67_v20 = vld [vmem:[%s661_s1 + $0xa8] sm:$0xff]  ;;  %v66_v22 = vld [vmem:[%s661_s1 + $0xa0] sm:$0xff] }
   0x8   :  { %258 = vmatprep.subr.mxu0 %v74_v6  ;;  %335 = vmatprep.subr.mxu1 %v74_v6  ;;  %v52_v19 = vld [vmem:[%s661_s1 + $0x30] sm:$0xff]  ;;  %v51_v21 = vld [vmem:[%s661_s1 + $0x28] sm:$0xff]  ;;  %v50_v23 = vld [vmem:[%s661_s1 + $0x20] sm:$0xff] }
   0x9   :  { %259 = vmatpush3.msra.mxu0 %v58_v7  ;;  %351 = vmatpush3.msra.mxu1 %v58_v7  ;;  %v65_v24 = vld [vmem:[%s661_s1 + $0x98] sm:$0xff]  ;;  %v64_v26 = vld [vmem:[%s661_s1 + $0x90] sm:$0xff]  ;;  %v63_v28 = vld [vmem:[%s661_s1 + $0x88] sm:$0xff] }
   0xa   :  { %260 = vmatprep.subr.mxu0 %v73_v8  ;;  %336 = vmatprep.subr.mxu1 %v73_v8  ;;  %v49_v25 = vld [vmem:[%s661_s1 + $0x18] sm:$0xff]  ;;  %v48_v27 = vld [vmem:[%s661_s1 + $0x10] sm:$0xff]  ;;  %v47_v29 = vld [vmem:[%s661_s1 + $0x8] sm:$0xff] }
   0xb   :  { %261 = vmatpush3.msra.mxu0 %v57_v9  ;;  %352 = vmatpush3.msra.mxu1 %v57_v9  ;;  %v62_v30 = vld [vmem:[%s661_s1 + $0x80] sm:$0xff]  ;;  %v15_v32 = vld [vmem:[%s662_s0 + $0x8] sm:$0xff]  ;;  %v17_v36 = vld [vmem:[%s662_s0 + $0x18] sm:$0xff] }
   0xc   :  { %262 = vmatprep.subr.mxu0 %v72_v10  ;;  %337 = vmatprep.subr.mxu1 %v72_v10  ;;  %v46_v31 = vld [vmem:[%s661_s1] sm:$0xff]  ;;  %v31_v33 = vld [vmem:[%s662_s0 + $0x88] sm:$0xff]  ;;  %v33_v37 = vld [vmem:[%s662_s0 + $0x98] sm:$0xff] }
   0xd   :  { %263 = vmatpush3.msra.mxu0 %v56_v11  ;;  %353 = vmatpush3.msra.mxu1 %v56_v11  ;;  %v14_v34 = vld [vmem:[%s662_s0] sm:$0xff]  ;;  %v16_v38 = vld [vmem:[%s662_s0 + $0x10] sm:$0xff]  ;;  %v19_v40 = vld [vmem:[%s662_s0 + $0x28] sm:$0xff] }
   0xe   :  { %264 = vmatprep.subr.mxu0 %v71_v12  ;;  %338 = vmatprep.subr.mxu1 %v71_v12  ;;  %v30_v35 = vld [vmem:[%s662_s0 + $0x80] sm:$0xff]  ;;  %v32_v39 = vld [vmem:[%s662_s0 + $0x90] sm:$0xff]  ;;  %v35_v41 = vld [vmem:[%s662_s0 + $0xa8] sm:$0xff] }
   0xf   :  { %265 = vmatpush3.msra.mxu0 %v55_v13  ;;  %354 = vmatpush3.msra.mxu1 %v55_v13  ;;  %v18_v42 = vld [vmem:[%s662_s0 + $0x20] sm:$0xff]  ;;  %v21_v44 = vld [vmem:[%s662_s0 + $0x38] sm:$0xff]  ;;  %v20_v46 = vld [vmem:[%s662_s0 + $0x30] sm:$0xff] }
  0x10   :  { %266 = vmatprep.subr.mxu0 %v70_v14  ;;  %339 = vmatprep.subr.mxu1 %v70_v14  ;;  %v34_v43 = vld [vmem:[%s662_s0 + $0xa0] sm:$0xff]  ;;  %v37_v45 = vld [vmem:[%s662_s0 + $0xb8] sm:$0xff]  ;;  %v36_v47 = vld [vmem:[%s662_s0 + $0xb0] sm:$0xff] }
  0x11   :  { %267 = vmatpush3.msra.mxu0 %v54_v15  ;;  %355 = vmatpush3.msra.mxu1 %v54_v15  ;;  %v23_v48 = vld [vmem:[%s662_s0 + $0x48] sm:$0xff]  ;;  %v22_v50 = vld [vmem:[%s662_s0 + $0x40] sm:$0xff]  ;;  %v25_v52 = vld [vmem:[%s662_s0 + $0x58] sm:$0xff] }
  0x12   :  { %268 = vmatprep.subr.mxu0 %v69_v16  ;;  %340 = vmatprep.subr.mxu1 %v69_v16  ;;  %v39_v49 = vld [vmem:[%s662_s0 + $0xc8] sm:$0xff]  ;;  %v38_v51 = vld [vmem:[%s662_s0 + $0xc0] sm:$0xff]  ;;  %v41_v53 = vld [vmem:[%s662_s0 + $0xd8] sm:$0xff] }
  0x13   :  { %269 = vmatpush3.msra.mxu0 %v53_v17  ;;  %356 = vmatpush3.msra.mxu1 %v53_v17  ;;  %v24_v54 = vld [vmem:[%s662_s0 + $0x50] sm:$0xff]  ;;  %v27_v56 = vld [vmem:[%s662_s0 + $0x68] sm:$0xff]  ;;  %v26_v58 = vld [vmem:[%s662_s0 + $0x60] sm:$0xff] }
  0x14   :  { %270 = vmatprep.subr.mxu0 %v68_v18  ;;  %341 = vmatprep.subr.mxu1 %v68_v18  ;;  %v40_v55 = vld [vmem:[%s662_s0 + $0xd0] sm:$0xff]  ;;  %v43_v57 = vld [vmem:[%s662_s0 + $0xe8] sm:$0xff]  ;;  %v42_v59 = vld [vmem:[%s662_s0 + $0xe0] sm:$0xff] }
  0x15   :  { %271 = vmatpush3.msra.mxu0 %v52_v19  ;;  %357 = vmatpush3.msra.mxu1 %v52_v19  ;;  %v29_v60 = vld [vmem:[%s662_s0 + $0x78] sm:$0xff]  ;;  %v28_v62 = vld [vmem:[%s662_s0 + $0x70] sm:$0xff]  ;;  %v579_v2 = vld [vmem:[%s663_s2] ss:$0 sm:$0xff] }
  0x16   :  { %272 = vmatprep.subr.mxu0 %v67_v20  ;;  %342 = vmatprep.subr.mxu1 %v67_v20  ;;  %v45_v61 = vld [vmem:[%s662_s0 + $0xf8] sm:$0xff]  ;;  %v44_v63 = vld [vmem:[%s662_s0 + $0xf0] sm:$0xff] }
  0x17   :  { %273 = vmatpush3.msra.mxu0 %v51_v21  ;;  %358 = vmatpush3.msra.mxu1 %v51_v21 }
  0x18   :  { %274 = vmatprep.subr.mxu0 %v66_v22  ;;  %343 = vmatprep.subr.mxu1 %v66_v22 }
  0x19   :  { %275 = vmatpush3.msra.mxu0 %v50_v23  ;;  %359 = vmatpush3.msra.mxu1 %v50_v23 }
  0x1a   :  { %276 = vmatprep.subr.mxu0 %v65_v24  ;;  %344 = vmatprep.subr.mxu1 %v65_v24 }
  0x1b   :  { %277 = vmatpush3.msra.mxu0 %v49_v25  ;;  %360 = vmatpush3.msra.mxu1 %v49_v25 }
  0x1c   :  { %278 = vmatprep.subr.mxu0 %v64_v26  ;;  %345 = vmatprep.subr.mxu1 %v64_v26 }
  0x1d   :  { %279 = vmatpush3.msra.mxu0 %v48_v27  ;;  %361 = vmatpush3.msra.mxu1 %v48_v27 }
  0x1e   :  { %280 = vmatprep.subr.mxu0 %v63_v28  ;;  %346 = vmatprep.subr.mxu1 %v63_v28 }
  0x1f   :  { %281 = vmatpush3.msra.mxu0 %v47_v29  ;;  %362 = vmatpush3.msra.mxu1 %v47_v29 }
  0x20   :  { %282 = vmatprep.subr.mxu0 %v62_v30  ;;  %347 = vmatprep.subr.mxu1 %v62_v30 }
  0x21   :  { %283 = vmatpush3.msra.mxu0 %v46_v31  ;;  %363 = vmatpush3.msra.mxu1 %v46_v31 }
  0x22   :  { %149 = vmatprep.mubr.f32.mxu0 %v15_v32  ;;  %189 = vmatprep.mubr.f32.mxu1 %v31_v33 }
  0x23   :  { %150 = vmatmul.mubr.f32.vlgmr.msra.gmra.mxu0 %v14_v34  ;;  %190 = vmatmul.mubr.f32.vlgmr.msra.gmra.mxu1 %v30_v35 }
  0x24   :  { %154 = vmatprep.mubr.f32.mxu0 %v17_v36  ;;  %194 = vmatprep.mubr.f32.mxu1 %v33_v37 }
  0x27   :  { %155 = vmatmul.mubr.f32.gmra.mxu0 %v16_v38  ;;  %195 = vmatmul.mubr.f32.gmra.mxu1 %v32_v39 }
  0x28   :  { %159 = vmatprep.mubr.f32.mxu0 %v19_v40  ;;  %199 = vmatprep.mubr.f32.mxu1 %v35_v41 }
  0x2b   :  { %160 = vmatmul.mubr.f32.gmra.mxu0 %v18_v42  ;;  %200 = vmatmul.mubr.f32.gmra.mxu1 %v34_v43 }
  0x2c   :  { %164 = vmatprep.mubr.f32.mxu0 %v21_v44  ;;  %204 = vmatprep.mubr.f32.mxu1 %v37_v45 }
  0x2f   :  { %165 = vmatmul.mubr.f32.gmra.mxu0 %v20_v46  ;;  %205 = vmatmul.mubr.f32.gmra.mxu1 %v36_v47 }
  0x30   :  { %169 = vmatprep.mubr.f32.mxu0 %v23_v48  ;;  %209 = vmatprep.mubr.f32.mxu1 %v39_v49 }
  0x33   :  { %170 = vmatmul.mubr.f32.gmra.mxu0 %v22_v50  ;;  %210 = vmatmul.mubr.f32.gmra.mxu1 %v38_v51 }
  0x34   :  { %174 = vmatprep.mubr.f32.mxu0 %v25_v52  ;;  %214 = vmatprep.mubr.f32.mxu1 %v41_v53 }
  0x37   :  { %175 = vmatmul.mubr.f32.gmra.mxu0 %v24_v54  ;;  %215 = vmatmul.mubr.f32.gmra.mxu1 %v40_v55 }
  0x38   :  { %179 = vmatprep.mubr.f32.mxu0 %v27_v56  ;;  %219 = vmatprep.mubr.f32.mxu1 %v43_v57 }
  0x3b   :  { %180 = vmatmul.mubr.f32.gmra.mxu0 %v26_v58  ;;  %220 = vmatmul.mubr.f32.gmra.mxu1 %v42_v59 }
  0x3c   :  { %184 = vmatprep.mubr.f32.mxu0 %v29_v60  ;;  %224 = vmatprep.mubr.f32.mxu1 %v45_v61 }
  0x3f   :  { %185 = vmatmul.mubr.f32.gmra.mxu0 %v28_v62  ;;  %225 = vmatmul.mubr.f32.gmra.mxu1 %v44_v63 }
  0xe3   :  { %v284_v0 = vpop.f32.mrf.mxu0  ;;  %v308_v1 = vpop.f32.mrf.mxu1 }
  0xe5   :  { %v285_v3 = vpop.f32.mrf.mxu0  ;;  %v309_v4 = vpop.f32.mrf.mxu1 }
  0xe6   :  { %v286_v5 = vadd.f32 %v285_v3, %v284_v0  ;;  %v310_v6 = vadd.f32 %v309_v4, %v308_v1 }
  0xe7   :  { %v287_v7 = vpop.f32.mrf.mxu0  ;;  %v311_v8 = vpop.f32.mrf.mxu1 }
  0xe8   :  { %v152_v9 = vadd.f32 %v286_v5, %v579_v2  ;;  %v192_v10 = vadd.f32 %v310_v6, %v579_v2 }
  0xe9   :  { %v288_v11 = vpop.f32.mrf.mxu0  ;;  %v312_v12 = vpop.f32.mrf.mxu1 }
  0xea   :  { %231 = vst.msk [vmem:[%s664_s3] sm:$0xff] %vm230_vm0, %v152_v9  ;;  %239 = vst.msk [vmem:[%s664_s3 + $0x40] sm:$0xff] %vm230_vm0, %v192_v10  ;;  %v289_v13 = vadd.f32 %v288_v11, %v287_v7  ;;  %v313_v14 = vadd.f32 %v312_v12, %v311_v8 }
  0xeb   :  { %v290_v15 = vpop.f32.mrf.mxu0  ;;  %v314_v16 = vpop.f32.mrf.mxu1 }
  0xec   :  { %v157_v17 = vadd.f32 %v289_v13, %v579_v2  ;;  %v197_v18 = vadd.f32 %v313_v14, %v579_v2 }
  0xed   :  { %v291_v19 = vpop.f32.mrf.mxu0  ;;  %v315_v20 = vpop.f32.mrf.mxu1 }
  0xee   :  { %232 = vst.msk [vmem:[%s664_s3 + $0x8] sm:$0xff] %vm230_vm0, %v157_v17  ;;  %240 = vst.msk [vmem:[%s664_s3 + $0x48] sm:$0xff] %vm230_vm0, %v197_v18  ;;  %v292_v21 = vadd.f32 %v291_v19, %v290_v15  ;;  %v316_v22 = vadd.f32 %v315_v20, %v314_v16 }
  0xef   :  { %v293_v23 = vpop.f32.mrf.mxu0  ;;  %v317_v24 = vpop.f32.mrf.mxu1 }
  0xf0   :  { %v162_v25 = vadd.f32 %v292_v21, %v579_v2  ;;  %v202_v26 = vadd.f32 %v316_v22, %v579_v2 }
  0xf1   :  { %v294_v27 = vpop.f32.mrf.mxu0  ;;  %v318_v28 = vpop.f32.mrf.mxu1 }
  0xf2   :  { %233 = vst.msk [vmem:[%s664_s3 + $0x10] sm:$0xff] %vm230_vm0, %v162_v25  ;;  %241 = vst.msk [vmem:[%s664_s3 + $0x50] sm:$0xff] %vm230_vm0, %v202_v26  ;;  %v295_v29 = vadd.f32 %v294_v27, %v293_v23  ;;  %v319_v30 = vadd.f32 %v318_v28, %v317_v24 }
  0xf3   :  { %v296_v31 = vpop.f32.mrf.mxu0  ;;  %v320_v32 = vpop.f32.mrf.mxu1 }
  0xf4   :  { %v167_v33 = vadd.f32 %v295_v29, %v579_v2  ;;  %v207_v34 = vadd.f32 %v319_v30, %v579_v2 }
  0xf5   :  { %v297_v35 = vpop.f32.mrf.mxu0  ;;  %v321_v36 = vpop.f32.mrf.mxu1 }
  0xf6   :  { %234 = vst.msk [vmem:[%s664_s3 + $0x18] sm:$0xff] %vm230_vm0, %v167_v33  ;;  %242 = vst.msk [vmem:[%s664_s3 + $0x58] sm:$0xff] %vm230_vm0, %v207_v34  ;;  %v298_v37 = vadd.f32 %v297_v35, %v296_v31  ;;  %v322_v38 = vadd.f32 %v321_v36, %v320_v32 }
  0xf7   :  { %v299_v39 = vpop.f32.mrf.mxu0  ;;  %v323_v40 = vpop.f32.mrf.mxu1 }
  0xf8   :  { %v172_v41 = vadd.f32 %v298_v37, %v579_v2  ;;  %v212_v42 = vadd.f32 %v322_v38, %v579_v2 }
  0xf9   :  { %v300_v43 = vpop.f32.mrf.mxu0  ;;  %v324_v44 = vpop.f32.mrf.mxu1 }
  0xfa   :  { %235 = vst.msk [vmem:[%s664_s3 + $0x20] sm:$0xff] %vm230_vm0, %v172_v41  ;;  %243 = vst.msk [vmem:[%s664_s3 + $0x60] sm:$0xff] %vm230_vm0, %v212_v42  ;;  %v301_v45 = vadd.f32 %v300_v43, %v299_v39  ;;  %v325_v46 = vadd.f32 %v324_v44, %v323_v40 }
  0xfb   :  { %v302_v47 = vpop.f32.mrf.mxu0  ;;  %v326_v48 = vpop.f32.mrf.mxu1 }
  0xfc   :  { %v177_v49 = vadd.f32 %v301_v45, %v579_v2  ;;  %v217_v50 = vadd.f32 %v325_v46, %v579_v2 }
  0xfd   :  { %v303_v51 = vpop.f32.mrf.mxu0  ;;  %v327_v52 = vpop.f32.mrf.mxu1 }
  0xfe   :  { %236 = vst.msk [vmem:[%s664_s3 + $0x28] sm:$0xff] %vm230_vm0, %v177_v49  ;;  %244 = vst.msk [vmem:[%s664_s3 + $0x68] sm:$0xff] %vm230_vm0, %v217_v50  ;;  %v304_v53 = vadd.f32 %v303_v51, %v302_v47  ;;  %v328_v54 = vadd.f32 %v327_v52, %v326_v48 }
  0xff   :  { %v305_v55 = vpop.f32.mrf.mxu0  ;;  %v329_v56 = vpop.f32.mrf.mxu1 }
 0x100   :  { %v182_v57 = vadd.f32 %v304_v53, %v579_v2  ;;  %v222_v58 = vadd.f32 %v328_v54, %v579_v2 }
 0x101   :  { %v306_v59 = vpop.f32.mrf.mxu0  ;;  %v330_v60 = vpop.f32.mrf.mxu1 }
 0x102   :  { %237 = vst.msk [vmem:[%s664_s3 + $0x30] sm:$0xff] %vm230_vm0, %v182_v57  ;;  %245 = vst.msk [vmem:[%s664_s3 + $0x70] sm:$0xff] %vm230_vm0, %v222_v58  ;;  %v307_v61 = vadd.f32 %v306_v59, %v305_v55  ;;  %v331_v62 = vadd.f32 %v330_v60, %v329_v56 }
 0x104   :  { %v187_v63 = vadd.f32 %v307_v61, %v579_v2  ;;  %v227_v0 = vadd.f32 %v331_v62, %v579_v2 }
 0x106   :  { %238 = vst.msk [vmem:[%s664_s3 + $0x38] sm:$0xff] %vm230_vm0, %v187_v63  ;;  %246 = vst.msk [vmem:[%s664_s3 + $0x78] sm:$0xff] %vm230_vm0, %v227_v0 }

</bundles_post_ra>
